<compile_context>
chip_gen: v7x
topology: tpu7x:2x2x1
jax: 0.10.0
libtpu: 0.0.40
codegen_flags: <defaults>
</compile_context>

<pallas_src>
import functools

import jax
import jax.numpy as jnp
from jax.experimental import pallas as pl
from jax.experimental.pallas import tpu as pltpu

DROP_P = 0.3
MiB = 1 << 20

# Conservative budgets so the chosen tiling also fits v7x (64 MiB / TensorCore;
# with "parallel" grid sharding each TC holds its own copy of the residents).
_FUSED_VMEM_BUDGET = 44 * MiB     # threshold for the all-resident small-N path
_STREAM_VMEM_BUDGET = 48 * MiB    # target working set for the streamed path


def _clamp_vmem(nbytes):
    """Explicit scoped-VMEM limit: >= what we need, <= v7x physical per-TC."""
    return int(min(60 * MiB, max(32 * MiB, nbytes)))


def _resident_spec(block_shape, index_map):
    """BlockSpec for a grid-invariant input: single-buffered when supported
    (the second pipeline buffer is pure waste for an invariant block)."""
    buffered = getattr(pl, "Buffered", None)
    if buffered is not None:
        try:
            return pl.BlockSpec(block_shape, index_map, pipeline_mode=buffered(1))
        except TypeError:
            pass
    return pl.BlockSpec(block_shape, index_map)


# --------------------------------------------------------------------------
# Kernels
# --------------------------------------------------------------------------
def _proj_kernel(h_ref, w_ref, o_ref):
    """hW = h @ W for one row tile of h (bf16 operands, f32 MXU accumulation)."""
    o_ref[...] = jnp.dot(h_ref[...], w_ref[...],
                         preferred_element_type=jnp.float32).astype(jnp.bfloat16)


def _gcn_stream_kernel(*refs, scale, has_next):
    """One GCN layer for one row tile of A.

    refs (has_next=True):  a[TM,N] hW[N,F] b[1,F] m[TM,F] Wn[F,Fn] | o[TM,F] hWn[TM,Fn]
    refs (has_next=False): a[TM,N] hW[N,F] b[1,F] m[TM,F]          | o[TM,F]
    """
    if has_next:
        a_ref, hw_ref, b_ref, m_ref, wn_ref, o_ref, hwn_ref = refs
    else:
        a_ref, hw_ref, b_ref, m_ref, o_ref = refs

    # Single N^2 matmul per tile: bf16 operands, f32 accumulation on the MXU.
    y = jnp.dot(a_ref[...], hw_ref[...], preferred_element_type=jnp.float32)
    y = jnp.maximum(y + b_ref[...], 0.0)                  # bias + ReLU (f32 VPU)
    y = y * (m_ref[...].astype(jnp.float32) * scale)      # dropout (mask is {0,1} bf16)
    o_ref[...] = y
    if has_next:
        # Fuse next layer's feature projection: hW_next = y.bf16 @ W_next.
        hwn_ref[...] = jnp.dot(y.astype(jnp.bfloat16), wn_ref[...],
                               preferred_element_type=jnp.float32
                               ).astype(jnp.bfloat16)


def _fused_kernel(a_ref, x_ref,
                  w1_ref, b1_ref, m1_ref,
                  w2_ref, b2_ref, m2_ref,
                  w3_ref, b3_ref, m3_ref,
                  o1_ref, o2_ref, o3_ref, *, scale):
    """Small-N fast path: all three layers with A resident in VMEM."""
    a = a_ref[...]

    def layer(h_bf16, w_ref, b_ref, m_ref):
        hw = jnp.dot(h_bf16, w_ref[...],
                     preferred_element_type=jnp.float32).astype(jnp.bfloat16)
        y = jnp.dot(a, hw, preferred_element_type=jnp.float32)
        y = jnp.maximum(y + b_ref[...], 0.0)
        return y * (m_ref[...].astype(jnp.float32) * scale)

    y1 = layer(x_ref[...], w1_ref, b1_ref, m1_ref)
    o1_ref[...] = y1
    y2 = layer(y1.astype(jnp.bfloat16), w2_ref, b2_ref, m2_ref)
    o2_ref[...] = y2
    y3 = layer(y2.astype(jnp.bfloat16), w3_ref, b3_ref, m3_ref)
    o3_ref[...] = y3


# --------------------------------------------------------------------------
# VMEM budgeting
# --------------------------------------------------------------------------
def _fused_vmem_bytes(n, feat_dims):
    f_in = feat_dims[0]
    total = 2 * n * n + 2 * n * f_in          # A bf16, x bf16
    prev = f_in
    for f in feat_dims[1:]:
        total += 2 * prev * f + 4 * f         # W bf16, bias f32
        total += 2 * n * f                    # mask bf16
        total += 4 * n * f                    # output f32
        total += 8 * n * f                    # in-kernel temps (hW bf16, y f32) + slack
        prev = f
    return total


def _stream_vmem_bytes(n, tm, f_out, f_next):
    total = 2 * tm * n * 2                    # A row tile bf16, double buffered
    total += n * f_out * 2                    # hW resident bf16 (single buffered)
    total += 2 * tm * f_out * 2               # mask tiles bf16
    total += 2 * tm * f_out * 4               # f32 output tiles
    total += 2 * f_out * 4                    # bias
    if f_next:
        total += f_out * f_next * 2           # W_next resident bf16
        total += 2 * tm * f_next * 2          # hW_next output tiles bf16
    return total


def _pick_tile(n, tile_m, f_out, f_next):
    tm = min(tile_m, n)
    while tm > 128 and _stream_vmem_bytes(n, tm, f_out, f_next) > _STREAM_VMEM_BUDGET:
        tm //= 2
    return tm


# --------------------------------------------------------------------------
# Wrappers (pallas_call)
# --------------------------------------------------------------------------
def _project(h_bf, w_bf, *, tile_m):
    n, f_in = h_bf.shape
    f_out = w_bf.shape[1]
    tm = min(tile_m, n)
    vmem = _clamp_vmem(2 * tm * (f_in + f_out) * 2 + f_in * f_out * 2 + 2 * MiB)
    return pl.pallas_call(
        _proj_kernel,
        grid=(pl.cdiv(n, tm),),
        in_specs=[
            pl.BlockSpec((tm, f_in), lambda i: (i, 0)),      # h row tile (streamed)
            _resident_spec((f_in, f_out), lambda i: (0, 0)), # W (resident)
        ],
        out_specs=pl.BlockSpec((tm, f_out), lambda i: (i, 0)),
        out_shape=jax.ShapeDtypeStruct((n, f_out), jnp.bfloat16),
        compiler_params=pltpu.CompilerParams(
            dimension_semantics=("parallel",),
            vmem_limit_bytes=vmem),
    )(h_bf, w_bf)


def _gcn_layer_streamed(a_bf, hw_bf, b, mask_bf, w_next_bf, *, drop_p, tile_m):
    n = a_bf.shape[0]
    f_out = hw_bf.shape[1]
    has_next = w_next_bf is not None
    f_next = w_next_bf.shape[1] if has_next else None
    tm = _pick_tile(n, tile_m, f_out, f_next)
    scale = 1.0 / (1.0 - drop_p)
    vmem = _clamp_vmem(_stream_vmem_bytes(n, tm, f_out, f_next) + 2 * MiB)

    in_specs = [
        pl.BlockSpec((tm, n), lambda i: (i, 0)),          # A row tile (streamed)
        _resident_spec((n, f_out), lambda i: (0, 0)),     # hW = h @ W (resident)
        _resident_spec((1, f_out), lambda i: (0, 0)),     # bias (resident)
        pl.BlockSpec((tm, f_out), lambda i: (i, 0)),      # dropout keep-mask tile
    ]
    args = [a_bf, hw_bf, b, mask_bf]
    out_specs = [pl.BlockSpec((tm, f_out), lambda i: (i, 0))]
    out_shape = [jax.ShapeDtypeStruct((n, f_out), jnp.float32)]
    if has_next:
        in_specs.append(_resident_spec((f_out, f_next), lambda i: (0, 0)))
        args.append(w_next_bf)
        out_specs.append(pl.BlockSpec((tm, f_next), lambda i: (i, 0)))
        out_shape.append(jax.ShapeDtypeStruct((n, f_next), jnp.bfloat16))

    kernel = functools.partial(_gcn_stream_kernel, scale=scale, has_next=has_next)
    outs = pl.pallas_call(
        kernel,
        grid=(pl.cdiv(n, tm),),
        in_specs=in_specs,
        out_specs=out_specs,
        out_shape=out_shape,
        compiler_params=pltpu.CompilerParams(
            dimension_semantics=("parallel",),   # v7x: shard row tiles across TCs
            vmem_limit_bytes=vmem),
    )(*args)
    return (outs[0], outs[1]) if has_next else (outs[0], None)


def _fused_forward(a_bf, x_bf, w1_bf, b1, m1, w2_bf, b2, m2, w3_bf, b3, m3,
                   *, drop_p):
    n = a_bf.shape[0]
    f_in = x_bf.shape[1]
    f1, f2, f3 = w1_bf.shape[1], w2_bf.shape[1], w3_bf.shape[1]
    scale = 1.0 / (1.0 - drop_p)
    vmem = _clamp_vmem(_fused_vmem_bytes(n, (f_in, f1, f2, f3)))

    def full(shape):
        return _resident_spec(shape, lambda i: (0, 0))

    kernel = functools.partial(_fused_kernel, scale=scale)
    outs = pl.pallas_call(
        kernel,
        grid=(1,),
        in_specs=[
            full((n, n)), full((n, f_in)),
            full((f_in, f1)), full((1, f1)), full((n, f1)),
            full((f1, f2)), full((1, f2)), full((n, f2)),
            full((f2, f3)), full((1, f3)), full((n, f3)),
        ],
        out_specs=[
            pl.BlockSpec((n, f1), lambda i: (0, 0)),
            pl.BlockSpec((n, f2), lambda i: (0, 0)),
            pl.BlockSpec((n, f3), lambda i: (0, 0)),
        ],
        out_shape=[
            jax.ShapeDtypeStruct((n, f1), jnp.float32),
            jax.ShapeDtypeStruct((n, f2), jnp.float32),
            jax.ShapeDtypeStruct((n, f3), jnp.float32),
        ],
        compiler_params=pltpu.CompilerParams(
            dimension_semantics=("arbitrary",),
            vmem_limit_bytes=vmem),
    )(a_bf, x_bf, w1_bf, b1, m1, w2_bf, b2, m2, w3_bf, b3, m3)
    return outs[0], outs[1], outs[2]


# --------------------------------------------------------------------------
# Public forward
# --------------------------------------------------------------------------
def _make_masks(key, n, dims, drop_p):
    """Pre-generated {0,1} bf16 dropout keep-masks (one per layer)."""
    keys = jax.random.split(key, len(dims))
    return tuple(
        jax.random.bernoulli(k, 1.0 - drop_p, (n, f)).astype(jnp.bfloat16)
        for k, f in zip(keys, dims))


@functools.partial(jax.jit, static_argnames=("tile_m", "drop_p", "mode"))
def user_gcn_forward(x, A, w1, b1, w2, b2, w3, b3, dropout_key, *,
                     tile_m=256, drop_p=DROP_P, mode="auto"):
    """out_k = dropout(relu(A @ (h_{k-1} @ W_k) + b_k), p=drop_p), k=1..3."""
    n, f_in = x.shape
    f1, f2, f3 = w1.shape[1], w2.shape[1], w3.shape[1]

    a_bf = A.astype(jnp.bfloat16)                 # cast A once; halves HBM/VMEM bytes
    x_bf = x.astype(jnp.bfloat16)
    w1_bf, w2_bf, w3_bf = (w.astype(jnp.bfloat16) for w in (w1, w2, w3))
    b1r, b2r, b3r = (b.reshape(1, -1).astype(jnp.float32) for b in (b1, b2, b3))

    m1, m2, m3 = _make_masks(dropout_key, n, (f1, f2, f3), drop_p)

    use_fused = (mode == "fused") or (
        mode == "auto"
        and _fused_vmem_bytes(n, (f_in, f1, f2, f3)) <= _FUSED_VMEM_BUDGET)

    if use_fused:
        return _fused_forward(a_bf, x_bf, w1_bf, b1r, m1, w2_bf, b2r, m2,
                              w3_bf, b3r, m3, drop_p=drop_p)

    # Streamed path for large N: hoisted hW, then one streamed matmul per layer.
    hw1 = _project(x_bf, w1_bf, tile_m=tile_m)
    out1, hw2 = _gcn_layer_streamed(a_bf, hw1, b1r, m1, w2_bf,
                                    drop_p=drop_p, tile_m=tile_m)
    out2, hw3 = _gcn_layer_streamed(a_bf, hw2, b2r, m2, w3_bf,
                                    drop_p=drop_p, tile_m=tile_m)
    out3, _ = _gcn_layer_streamed(a_bf, hw3, b3r, m3, None,
                                  drop_p=drop_p, tile_m=tile_m)
    return out1, out2, out3


# --------------------------------------------------------------------------
# Self-test
# --------------------------------------------------------------------------
def _glorot(key, shape):
    fan_in, fan_out = shape
    limit = jnp.sqrt(6.0 / (fan_in + fan_out))
    return jax.random.uniform(key, shape, jnp.float32, -limit, limit)


def _reference(x, A, w1, b1, w2, b2, w3, b3, masks, drop_p):
    scale = 1.0 / (1.0 - drop_p)
    m1, m2, m3 = (m.astype(jnp.float32) * scale for m in masks)
    r1 = jnp.maximum(A @ (x @ w1) + b1, 0.0) * m1
    r2 = jnp.maximum(A @ (r1 @ w2) + b2, 0.0) * m2
    r3 = jnp.maximum(A @ (r2 @ w3) + b3, 0.0) * m3
    return r1, r2, r3


if __name__ == "__main__":
    # config: out_dim=32, gcn_hidden=64, gcn_hidden2=64, gcn_out=32 (small synthetic)
    N, OUT_DIM, H1, H2, H3 = 256, 32, 64, 64, 32

    key = jax.random.PRNGKey(0)
    kx, ka, k1, k2, k3, kd = jax.random.split(key, 6)

    # Node features
    x = jax.random.normal(kx, (N, OUT_DIM), jnp.float32)

    # Dense, row-normalized adjacency with self-loops (what FG-CF passes as A)
    adj = (jax.random.uniform(ka, (N, N)) < 0.05).astype(jnp.float32)
    adj = jnp.maximum(adj, adj.T) + jnp.eye(N, dtype=jnp.float32)
    A = adj / jnp.sum(adj, axis=1, keepdims=True)

    # Deterministic parameter init (Glorot-uniform weights, zero bias)
    w1 = _glorot(k1, (OUT_DIM, H1)); b1 = jnp.zeros((1, H1), jnp.float32)
    w2 = _glorot(k2, (H1, H2));      b2 = jnp.zeros((1, H2), jnp.float32)
    w3 = _glorot(k3, (H2, H3));      b3 = jnp.zeros((1, H3), jnp.float32)

    # Path 1: auto dispatch (small N -> fused all-resident single pallas_call).
    fused_out = user_gcn_forward(x, A, w1, b1, w2, b2, w3, b3, kd)
    # Path 2: force the streamed row-tile pipeline (tile_m=128 -> 2 grid steps).
    stream_out = user_gcn_forward(x, A, w1, b1, w2, b2, w3, b3, kd,
                                  tile_m=128, mode="streamed")
    jax.block_until_ready((fused_out, stream_out))

    # Pure-JAX f32 reference using the identical dropout masks.
    masks = _make_masks(kd, N, (H1, H2, H3), DROP_P)
    refs = _reference(x, A, w1, b1, w2, b2, w3, b3, masks, DROP_P)

    def rel_err(o, r):
        return float(jnp.linalg.norm(o.astype(jnp.float32) - r) /
                     (jnp.linalg.norm(r) + 1e-12))

    for outs in (fused_out, stream_out):
        for o, r, shape in zip(outs, refs, ((N, H1), (N, H2), (N, H3))):
            assert o.shape == shape, (o.shape, shape)
            err = rel_err(o, r)
            assert err < 2e-2, err

    print("KERNEL_OK")
</pallas_src>

<mosaic_0001>
module attributes {stable_mosaic.version = 11 : i64} {
  func.func @_fused_kernel(%arg0: i32, %arg1: memref<256x256xbf16, #tpu.memory_space<vmem>>, %arg2: memref<256x32xbf16, #tpu.memory_space<vmem>>, %arg3: memref<32x64xbf16, #tpu.memory_space<vmem>>, %arg4: memref<1x64xf32, #tpu.memory_space<vmem>>, %arg5: memref<256x64xbf16, #tpu.memory_space<vmem>>, %arg6: memref<64x64xbf16, #tpu.memory_space<vmem>>, %arg7: memref<1x64xf32, #tpu.memory_space<vmem>>, %arg8: memref<256x64xbf16, #tpu.memory_space<vmem>>, %arg9: memref<64x32xbf16, #tpu.memory_space<vmem>>, %arg10: memref<1x32xf32, #tpu.memory_space<vmem>>, %arg11: memref<256x32xbf16, #tpu.memory_space<vmem>>, %arg12: memref<256x64xf32, #tpu.memory_space<vmem>>, %arg13: memref<256x64xf32, #tpu.memory_space<vmem>>, %arg14: memref<256x32xf32, #tpu.memory_space<vmem>>) attributes {dimension_semantics = [#tpu.dimension_semantics<arbitrary>], iteration_bounds = array<i64: 1>, scalar_prefetch = 0 : i64, scratch_operands = 0 : i64, tpu.core_type = #tpu.core_type<tc>, window_params = [{pipeline_mode = #tpu.pipeline_mode<synchronous>, transform_indices = @transform_0, window_bounds = array<i64: 256, 256>}, {pipeline_mode = #tpu.pipeline_mode<synchronous>, transform_indices = @transform_1, window_bounds = array<i64: 256, 32>}, {pipeline_mode = #tpu.pipeline_mode<synchronous>, transform_indices = @transform_2, window_bounds = array<i64: 32, 64>}, {pipeline_mode = #tpu.pipeline_mode<synchronous>, transform_indices = @transform_3, window_bounds = array<i64: 1, 64>}, {pipeline_mode = #tpu.pipeline_mode<synchronous>, transform_indices = @transform_4, window_bounds = array<i64: 256, 64>}, {pipeline_mode = #tpu.pipeline_mode<synchronous>, transform_indices = @transform_5, window_bounds = array<i64: 64, 64>}, {pipeline_mode = #tpu.pipeline_mode<synchronous>, transform_indices = @transform_6, window_bounds = array<i64: 1, 64>}, {pipeline_mode = #tpu.pipeline_mode<synchronous>, transform_indices = @transform_7, window_bounds = array<i64: 256, 64>}, {pipeline_mode = #tpu.pipeline_mode<synchronous>, transform_indices = @transform_8, window_bounds = array<i64: 64, 32>}, {pipeline_mode = #tpu.pipeline_mode<synchronous>, transform_indices = @transform_9, window_bounds = array<i64: 1, 32>}, {pipeline_mode = #tpu.pipeline_mode<synchronous>, transform_indices = @transform_10, window_bounds = array<i64: 256, 32>}, {pipeline_mode = #tpu.pipeline_mode<synchronous>, transform_indices = @transform_11, window_bounds = array<i64: 256, 64>}, {pipeline_mode = #tpu.pipeline_mode<synchronous>, transform_indices = @transform_12, window_bounds = array<i64: 256, 64>}, {pipeline_mode = #tpu.pipeline_mode<synchronous>, transform_indices = @transform_13, window_bounds = array<i64: 256, 32>}]} {
    %c0 = arith.constant 0 : index
    %c0_0 = arith.constant 0 : index
    %0 = vector.load %arg1[%c0, %c0_0] : memref<256x256xbf16, #tpu.memory_space<vmem>>, vector<256x256xbf16>
    %c0_1 = arith.constant 0 : index
    %c0_2 = arith.constant 0 : index
    %1 = vector.load %arg2[%c0_1, %c0_2] : memref<256x32xbf16, #tpu.memory_space<vmem>>, vector<256x32xbf16>
    %c0_3 = arith.constant 0 : index
    %c0_4 = arith.constant 0 : index
    %2 = vector.load %arg3[%c0_3, %c0_4] : memref<32x64xbf16, #tpu.memory_space<vmem>>, vector<32x64xbf16>
    %cst = arith.constant dense<0.000000e+00> : vector<256x64xf32>
    %3 = tpu.matmul %1, %2, %cst {dimension_numbers = #tpu.dot_dimension_numbers<[1], [0], [0], [1], [0, 0, 1, 1], [], []>} : vector<256x32xbf16>, vector<32x64xbf16>, vector<256x64xf32> -> vector<256x64xf32>
    %4 = arith.truncf %3 : vector<256x64xf32> to vector<256x64xbf16>
    %cst_5 = arith.constant dense<0.000000e+00> : vector<256x64xf32>
    %5 = tpu.matmul %0, %4, %cst_5 {dimension_numbers = #tpu.dot_dimension_numbers<[1], [0], [0], [1], [0, 0, 1, 1], [], []>} : vector<256x256xbf16>, vector<256x64xbf16>, vector<256x64xf32> -> vector<256x64xf32>
    %c0_6 = arith.constant 0 : index
    %c0_7 = arith.constant 0 : index
    %6 = vector.load %arg4[%c0_6, %c0_7] : memref<1x64xf32, #tpu.memory_space<vmem>>, vector<1x64xf32>
    %7 = vector.broadcast %6 : vector<1x64xf32> to vector<256x64xf32>
    %8 = arith.addf %5, %7 : vector<256x64xf32>
    %cst_8 = arith.constant 0.000000e+00 : f32
    %9 = vector.broadcast %cst_8 : f32 to vector<256x64xf32>
    %10 = arith.maximumf %8, %9 : vector<256x64xf32>
    %c0_9 = arith.constant 0 : index
    %c0_10 = arith.constant 0 : index
    %11 = vector.load %arg5[%c0_9, %c0_10] : memref<256x64xbf16, #tpu.memory_space<vmem>>, vector<256x64xbf16>
    %12 = arith.extf %11 : vector<256x64xbf16> to vector<256x64xf32>
    %cst_11 = arith.constant 1.42857146 : f32
    %13 = vector.broadcast %cst_11 : f32 to vector<256x64xf32>
    %14 = arith.mulf %12, %13 : vector<256x64xf32>
    %15 = arith.mulf %10, %14 : vector<256x64xf32>
    %c0_12 = arith.constant 0 : index
    %c0_13 = arith.constant 0 : index
    %16 = vector.load %arg12[%c0_12, %c0_13] : memref<256x64xf32, #tpu.memory_space<vmem>>, vector<256x64xf32>
    tpu.vector_store %arg12[%c0_12, %c0_13], %15 {strides = array<i32>} : memref<256x64xf32, #tpu.memory_space<vmem>>, vector<256x64xf32>,
    %17 = arith.truncf %15 : vector<256x64xf32> to vector<256x64xbf16>
    %c0_14 = arith.constant 0 : index
    %c0_15 = arith.constant 0 : index
    %18 = vector.load %arg6[%c0_14, %c0_15] : memref<64x64xbf16, #tpu.memory_space<vmem>>, vector<64x64xbf16>
    %cst_16 = arith.constant dense<0.000000e+00> : vector<256x64xf32>
    %19 = tpu.matmul %17, %18, %cst_16 {dimension_numbers = #tpu.dot_dimension_numbers<[1], [0], [0], [1], [0, 0, 1, 1], [], []>} : vector<256x64xbf16>, vector<64x64xbf16>, vector<256x64xf32> -> vector<256x64xf32>
    %20 = arith.truncf %19 : vector<256x64xf32> to vector<256x64xbf16>
    %cst_17 = arith.constant dense<0.000000e+00> : vector<256x64xf32>
    %21 = tpu.matmul %0, %20, %cst_17 {dimension_numbers = #tpu.dot_dimension_numbers<[1], [0], [0], [1], [0, 0, 1, 1], [], []>} : vector<256x256xbf16>, vector<256x64xbf16>, vector<256x64xf32> -> vector<256x64xf32>
    %c0_18 = arith.constant 0 : index
    %c0_19 = arith.constant 0 : index
    %22 = vector.load %arg7[%c0_18, %c0_19] : memref<1x64xf32, #tpu.memory_space<vmem>>, vector<1x64xf32>
    %23 = vector.broadcast %22 : vector<1x64xf32> to vector<256x64xf32>
    %24 = arith.addf %21, %23 : vector<256x64xf32>
    %cst_20 = arith.constant 0.000000e+00 : f32
    %25 = vector.broadcast %cst_20 : f32 to vector<256x64xf32>
    %26 = arith.maximumf %24, %25 : vector<256x64xf32>
    %c0_21 = arith.constant 0 : index
    %c0_22 = arith.constant 0 : index
    %27 = vector.load %arg8[%c0_21, %c0_22] : memref<256x64xbf16, #tpu.memory_space<vmem>>, vector<256x64xbf16>
    %28 = arith.extf %27 : vector<256x64xbf16> to vector<256x64xf32>
    %cst_23 = arith.constant 1.42857146 : f32
    %29 = vector.broadcast %cst_23 : f32 to vector<256x64xf32>
    %30 = arith.mulf %28, %29 : vector<256x64xf32>
    %31 = arith.mulf %26, %30 : vector<256x64xf32>
    %c0_24 = arith.constant 0 : index
    %c0_25 = arith.constant 0 : index
    %32 = vector.load %arg13[%c0_24, %c0_25] : memref<256x64xf32, #tpu.memory_space<vmem>>, vector<256x64xf32>
    tpu.vector_store %arg13[%c0_24, %c0_25], %31 {strides = array<i32>} : memref<256x64xf32, #tpu.memory_space<vmem>>, vector<256x64xf32>,
    %33 = arith.truncf %31 : vector<256x64xf32> to vector<256x64xbf16>
    %c0_26 = arith.constant 0 : index
    %c0_27 = arith.constant 0 : index
    %34 = vector.load %arg9[%c0_26, %c0_27] : memref<64x32xbf16, #tpu.memory_space<vmem>>, vector<64x32xbf16>
    %cst_28 = arith.constant dense<0.000000e+00> : vector<256x32xf32>
    %35 = tpu.matmul %33, %34, %cst_28 {dimension_numbers = #tpu.dot_dimension_numbers<[1], [0], [0], [1], [0, 0, 1, 1], [], []>} : vector<256x64xbf16>, vector<64x32xbf16>, vector<256x32xf32> -> vector<256x32xf32>
    %36 = arith.truncf %35 : vector<256x32xf32> to vector<256x32xbf16>
    %cst_29 = arith.constant dense<0.000000e+00> : vector<256x32xf32>
    %37 = tpu.matmul %0, %36, %cst_29 {dimension_numbers = #tpu.dot_dimension_numbers<[1], [0], [0], [1], [0, 0, 1, 1], [], []>} : vector<256x256xbf16>, vector<256x32xbf16>, vector<256x32xf32> -> vector<256x32xf32>
    %c0_30 = arith.constant 0 : index
    %c0_31 = arith.constant 0 : index
    %38 = vector.load %arg10[%c0_30, %c0_31] : memref<1x32xf32, #tpu.memory_space<vmem>>, vector<1x32xf32>
    %39 = vector.broadcast %38 : vector<1x32xf32> to vector<256x32xf32>
    %40 = arith.addf %37, %39 : vector<256x32xf32>
    %cst_32 = arith.constant 0.000000e+00 : f32
    %41 = vector.broadcast %cst_32 : f32 to vector<256x32xf32>
    %42 = arith.maximumf %40, %41 : vector<256x32xf32>
    %c0_33 = arith.constant 0 : index
    %c0_34 = arith.constant 0 : index
    %43 = vector.load %arg11[%c0_33, %c0_34] : memref<256x32xbf16, #tpu.memory_space<vmem>>, vector<256x32xbf16>
    %44 = arith.extf %43 : vector<256x32xbf16> to vector<256x32xf32>
    %cst_35 = arith.constant 1.42857146 : f32
    %45 = vector.broadcast %cst_35 : f32 to vector<256x32xf32>
    %46 = arith.mulf %44, %45 : vector<256x32xf32>
    %47 = arith.mulf %42, %46 : vector<256x32xf32>
    %c0_36 = arith.constant 0 : index
    %c0_37 = arith.constant 0 : index
    %48 = vector.load %arg14[%c0_36, %c0_37] : memref<256x32xf32, #tpu.memory_space<vmem>>, vector<256x32xf32>
    tpu.vector_store %arg14[%c0_36, %c0_37], %47 {strides = array<i32>} : memref<256x32xf32, #tpu.memory_space<vmem>>, vector<256x32xf32>,
    return
  }
  func.func @transform_0(%arg0: i32) -> (i32, i32) {
    %c0_i32 = arith.constant 0 : i32
    %c0_i32_0 = arith.constant 0 : i32
    %c0_i32_1 = arith.constant 0 : i32
    return %c0_i32, %c0_i32_0 : i32, i32
  }
  func.func @transform_1(%arg0: i32) -> (i32, i32) {
    %c0_i32 = arith.constant 0 : i32
    %c0_i32_0 = arith.constant 0 : i32
    %c0_i32_1 = arith.constant 0 : i32
    return %c0_i32, %c0_i32_0 : i32, i32
  }
  func.func @transform_2(%arg0: i32) -> (i32, i32) {
    %c0_i32 = arith.constant 0 : i32
    %c0_i32_0 = arith.constant 0 : i32
    %c0_i32_1 = arith.constant 0 : i32
    return %c0_i32, %c0_i32_0 : i32, i32
  }
  func.func @transform_3(%arg0: i32) -> (i32, i32) {
    %c0_i32 = arith.constant 0 : i32
    %c0_i32_0 = arith.constant 0 : i32
    %c0_i32_1 = arith.constant 0 : i32
    return %c0_i32, %c0_i32_0 : i32, i32
  }
  func.func @transform_4(%arg0: i32) -> (i32, i32) {
    %c0_i32 = arith.constant 0 : i32
    %c0_i32_0 = arith.constant 0 : i32
    %c0_i32_1 = arith.constant 0 : i32
    return %c0_i32, %c0_i32_0 : i32, i32
  }
  func.func @transform_5(%arg0: i32) -> (i32, i32) {
    %c0_i32 = arith.constant 0 : i32
    %c0_i32_0 = arith.constant 0 : i32
    %c0_i32_1 = arith.constant 0 : i32
    return %c0_i32, %c0_i32_0 : i32, i32
  }
  func.func @transform_6(%arg0: i32) -> (i32, i32) {
    %c0_i32 = arith.constant 0 : i32
    %c0_i32_0 = arith.constant 0 : i32
    %c0_i32_1 = arith.constant 0 : i32
    return %c0_i32, %c0_i32_0 : i32, i32
  }
  func.func @transform_7(%arg0: i32) -> (i32, i32) {
    %c0_i32 = arith.constant 0 : i32
    %c0_i32_0 = arith.constant 0 : i32
    %c0_i32_1 = arith.constant 0 : i32
    return %c0_i32, %c0_i32_0 : i32, i32
  }
  func.func @transform_8(%arg0: i32) -> (i32, i32) {
    %c0_i32 = arith.constant 0 : i32
    %c0_i32_0 = arith.constant 0 : i32
    %c0_i32_1 = arith.constant 0 : i32
    return %c0_i32, %c0_i32_0 : i32, i32
  }
  func.func @transform_9(%arg0: i32) -> (i32, i32) {
    %c0_i32 = arith.constant 0 : i32
    %c0_i32_0 = arith.constant 0 : i32
    %c0_i32_1 = arith.constant 0 : i32
    return %c0_i32, %c0_i32_0 : i32, i32
  }
  func.func @transform_10(%arg0: i32) -> (i32, i32) {
    %c0_i32 = arith.constant 0 : i32
    %c0_i32_0 = arith.constant 0 : i32
    %c0_i32_1 = arith.constant 0 : i32
    return %c0_i32, %c0_i32_0 : i32, i32
  }
  func.func @transform_11(%arg0: i32) -> (i32, i32) {
    %c0_i32 = arith.constant 0 : i32
    %c0_i32_0 = arith.constant 0 : i32
    %c0_i32_1 = arith.constant 0 : i32
    return %c0_i32, %c0_i32_0 : i32, i32
  }
  func.func @transform_12(%arg0: i32) -> (i32, i32) {
    %c0_i32 = arith.constant 0 : i32
    %c0_i32_0 = arith.constant 0 : i32
    %c0_i32_1 = arith.constant 0 : i32
    return %c0_i32, %c0_i32_0 : i32, i32
  }
  func.func @transform_13(%arg0: i32) -> (i32, i32) {
    %c0_i32 = arith.constant 0 : i32
    %c0_i32_0 = arith.constant 0 : i32
    %c0_i32_1 = arith.constant 0 : i32
    return %c0_i32, %c0_i32_0 : i32, i32
  }
}

</mosaic_0001>

<bundles_post_ra>
// kernel: user_gcn_forward.1
= control target key start
LH: loop header
LB: loop body
LE: loop exit
PB: predicated region body
PF: predicated region fallthrough
CT: control target
= control target key end

     0   :  { %vm202_vm0 = vcmask 261120   ;;  %vm916_vm1 = vcmask 523264   ;;  %s4405_s2 = inlined_call_operand.vmem [shape: bf16[32,64], index: 2, kind: input, shape index: {}]   ;;  %s4406_s1 = inlined_call_operand.vmem [shape: bf16[256,32], index: 1, kind: input, shape index: {}]   ;;  %s4407_s0 = inlined_call_operand.vmem [shape: bf16[256,256], index: 0, kind: input, shape index: {}]   ;;  %s4408_s5 = inlined_call_operand.vmem [shape: bf16[64,64], index: 5, kind: input, shape index: {}]   ;;  %s4409_s4 = inlined_call_operand.vmem [shape: bf16[256,64], index: 4, kind: input, shape index: {}]   ;;  %s4410_s3 = inlined_call_operand.vmem [shape: f32[1,64], index: 3, kind: input, shape index: {}]   ;;  %s4411_s11 = inlined_call_operand.vmem [shape: f32[256,64], index: 11, kind: output, shape index: {0}]   ;;  %s4412_s8 = inlined_call_operand.vmem [shape: bf16[64,32], index: 8, kind: input, shape index: {}]   ;;  %s4413_s7 = inlined_call_operand.vmem [shape: bf16[256,64], index: 7, kind: input, shape index: {}]   ;;  %s4414_s6 = inlined_call_operand.vmem [shape: f32[1,64], index: 6, kind: input, shape index: {}]   ;;  %s4415_s12 = inlined_call_operand.vmem [shape: f32[256,64], index: 12, kind: output, shape index: {1}]   ;;  %s4416_s10 = inlined_call_operand.vmem [shape: bf16[256,32], index: 10, kind: input, shape index: {}]   ;;  %s4417_s9 = inlined_call_operand.vmem [shape: f32[1,32], index: 9, kind: input, shape index: {}]   ;;  %s4418_s13 = inlined_call_operand.vmem [shape: f32[256,32], index: 13, kind: output, shape index: {2}]  }
   0x1   :  { %v3099_v0 = vld [vmem:[%s4405_s2] sm:$0xff]   ;;  %v3100_v1 = vld [vmem:[%s4405_s2 + $0x8] sm:$0xff]   ;;  %v3103_v4 = vld [vmem:[%s4406_s1 + $0x10] sm:$0xff]  }
   0x2   :  { %2967 = vmatprep.subr.bf16.mxu0 %v3099_v0  ;;  %v3101_v2 = vld [vmem:[%s4406_s1] sm:$0xff]   ;;  %v3102_v3 = vld [vmem:[%s4406_s1 + $0x8] sm:$0xff]   ;;  %v3104_v5 = vld [vmem:[%s4406_s1 + $0x18] sm:$0xff]  }
   0x3   :  { %2968 = vmatpush3.bf16.msra.mxu0 %v3099_v0  ;;  %2971 = vmatprep.mubr.msk.bf16.mxu0 %vm202_vm0, %v3101_v2  ;;  %v3105_v6 = vld [vmem:[%s4406_s1 + $0x20] sm:$0xff]   ;;  %v3106_v7 = vld [vmem:[%s4406_s1 + $0x28] sm:$0xff]   ;;  %v3107_v8 = vld [vmem:[%s4406_s1 + $0x30] sm:$0xff]  }
   0x4   :  { %2969 = vmatprep.subr.bf16.mxu0 %v3100_v1  ;;  %v3108_v9 = vld [vmem:[%s4406_s1 + $0x38] sm:$0xff]   ;;  %v3109_v10 = vld [vmem:[%s4406_s1 + $0x40] sm:$0xff]   ;;  %v3110_v11 = vld [vmem:[%s4406_s1 + $0x48] sm:$0xff]  }
   0x5   :  { %v3111_v12 = vld [vmem:[%s4406_s1 + $0x50] sm:$0xff]   ;;  %v3112_v13 = vld [vmem:[%s4406_s1 + $0x58] sm:$0xff]   ;;  %v3113_v14 = vld [vmem:[%s4406_s1 + $0x60] sm:$0xff]  }
   0x6   :  { %v3114_v15 = vld [vmem:[%s4406_s1 + $0x68] sm:$0xff]   ;;  %v3115_v16 = vld [vmem:[%s4406_s1 + $0x70] sm:$0xff]   ;;  %v3116_v17 = vld [vmem:[%s4406_s1 + $0x78] sm:$0xff]  }
   0x7   :  { %2970 = vmatpush3.bf16.msra.mxu0 %v3100_v1  ;;  %v3119_v18 = vld [vmem:[%s4407_s0 + $0x4] ss:$8 sps:$4 sm:$0xff]   ;;  %v3120_v19 = vld [vmem:[%s4407_s0 + $0x54] ss:$8 sps:$4 sm:$0xff]  }
   0x8   :  { %667 = vmatprep.mubr.bf16.mxu1 %v3120_v19  ;;  %v3441_v19 = vld [vmem:[%s4407_s0 + $0x94] ss:$8 sps:$4 sm:$0xff]  }
   0xa   :  { %2972 = vmatmul.mubr.msk.bf16.vlgmr.msra.gmra.mrb[0].mxu0 %vm202_vm0, %v3102_v3 }
   0xb   :  { %2975 = vmatprep.mubr.msk.bf16.mxu0 %vm202_vm0, %v3103_v4  ;;  %v3354_v4 = vld [vmem:[%s4407_s0] ss:$8 sps:$4 sm:$0xff]  }
  0x12   :  { %2976 = vmatmul.mubr.msk.bf16.gmra.mrb[4].mxu0 %vm202_vm0, %v3104_v5  ;;  %v3359_v5 = vld [vmem:[%s4407_s0 + $0x50] ss:$8 sps:$4 sm:$0xff]  }
  0x13   :  { %2979 = vmatprep.mubr.msk.bf16.mxu0 %vm202_vm0, %v3105_v6  ;;  %v3364_v6 = vld [vmem:[%s4407_s0 + $0x14] ss:$8 sps:$4 sm:$0xff]  }
  0x1a   :  { %2980 = vmatmul.mubr.msk.bf16.gmra.mrb[8].mxu0 %vm202_vm0, %v3106_v7  ;;  %v3369_v7 = vld [vmem:[%s4407_s0 + $0x64] ss:$8 sps:$4 sm:$0xff]  }
  0x1b   :  { %2983 = vmatprep.mubr.msk.bf16.mxu0 %vm202_vm0, %v3107_v8  ;;  %v3378_v8 = vld [vmem:[%s4407_s0 + $0x10] ss:$8 sps:$4 sm:$0xff]  }
  0x22   :  { %2984 = vmatmul.mubr.msk.bf16.gmra.mrb[12].mxu0 %vm202_vm0, %v3108_v9  ;;  %v3383_v9 = vld [vmem:[%s4407_s0 + $0x60] ss:$8 sps:$4 sm:$0xff]  }
  0x23   :  { %2987 = vmatprep.mubr.msk.bf16.mxu0 %vm202_vm0, %v3109_v10  ;;  %v3388_v10 = vld [vmem:[%s4407_s0 + $0x24] ss:$8 sps:$4 sm:$0xff]  }
  0x2a   :  { %2988 = vmatmul.mubr.msk.bf16.gmra.mrb[16].mxu0 %vm202_vm0, %v3110_v11  ;;  %v3393_v11 = vld [vmem:[%s4407_s0 + $0x74] ss:$8 sps:$4 sm:$0xff]  }
  0x2b   :  { %2991 = vmatprep.mubr.msk.bf16.mxu0 %vm202_vm0, %v3111_v12  ;;  %v3402_v12 = vld [vmem:[%s4407_s0 + $0x20] ss:$8 sps:$4 sm:$0xff]  }
  0x32   :  { %2992 = vmatmul.mubr.msk.bf16.gmra.mrb[20].mxu0 %vm202_vm0, %v3112_v13  ;;  %v3407_v13 = vld [vmem:[%s4407_s0 + $0x70] ss:$8 sps:$4 sm:$0xff]  }
  0x33   :  { %2995 = vmatprep.mubr.msk.bf16.mxu0 %vm202_vm0, %v3113_v14  ;;  %v3412_v14 = vld [vmem:[%s4407_s0 + $0x34] ss:$8 sps:$4 sm:$0xff]  }
  0x3a   :  { %2996 = vmatmul.mubr.msk.bf16.gmra.mrb[24].mxu0 %vm202_vm0, %v3114_v15  ;;  %v3417_v15 = vld [vmem:[%s4407_s0 + $0x84] ss:$8 sps:$4 sm:$0xff]  }
  0x3b   :  { %2999 = vmatprep.mubr.msk.bf16.mxu0 %vm202_vm0, %v3115_v16  ;;  %v3426_v16 = vld [vmem:[%s4407_s0 + $0x30] ss:$8 sps:$4 sm:$0xff]  }
  0x42   :  { %3000 = vmatmul.mubr.msk.bf16.gmra.mrb[28].mxu0 %vm202_vm0, %v3116_v17  ;;  %v3431_v17 = vld [vmem:[%s4407_s0 + $0x80] ss:$8 sps:$4 sm:$0xff]  }
  0x43   :  { %627 = vmatprep.mubr.bf16.mxu0 %v3119_v18  ;;  %v3436_v18 = vld [vmem:[%s4407_s0 + $0x44] ss:$8 sps:$4 sm:$0xff]  }
  0xdd   :  { %v2973_v20 = vpop.f32.mrb[0].mxu0 }
  0xde   :  { %v285_v21 = vpop.f32.mrb[1].mxu0 }
  0xdf   :  { %v2974_v22 = vpop.f32.mrb[2].mxu0 }
  0xe0   :  { %v413_v23 = vpack.c.bf16 %v2974_v22, %v2973_v20  ;;  %v288_v24 = vpop.f32.mrb[3].mxu0  ;;  %v3450_v20 = vld [vmem:[%s4407_s0 + $0x40] ss:$8 sps:$4 sm:$0xff]   ;;  %v3460_v22 = vld [vmem:[%s4407_s0 + $0xa4] ss:$8 sps:$4 sm:$0xff]  }
  0xe1   :  { %v412_v25 = vpack.c.bf16 %v288_v24, %v285_v21  ;;  %v3455_v21 = vld [vmem:[%s4407_s0 + $0x90] ss:$8 sps:$4 sm:$0xff]   ;;  %v3473_v24 = vld [vmem:[%s4407_s0 + $0xb4] ss:$8 sps:$4 sm:$0xff]  }
  0xe5   :  { %v2977_v26 = vpop.f32.mrb[4].mxu0 }
  0xe6   :  { %v301_v27 = vpop.f32.mrb[5].mxu0 }
  0xe7   :  { %v2978_v28 = vpop.f32.mrb[6].mxu0 }
  0xe8   :  { %v415_v29 = vpack.c.bf16 %v2978_v28, %v2977_v26  ;;  %v304_v30 = vpop.f32.mrb[7].mxu0  ;;  %v3485_v26 = vld [vmem:[%s4407_s0 + $0xc4] ss:$8 sps:$4 sm:$0xff]   ;;  %v3497_v28 = vld [vmem:[%s4407_s0 + $0xd4] ss:$8 sps:$4 sm:$0xff]  }
  0xe9   :  { %v414_v31 = vpack.c.bf16 %v304_v30, %v301_v27  ;;  %v3492_v27 = vld [vmem:[%s4407_s0 + $0xc0] ss:$8 sps:$4 sm:$0xff]   ;;  %v3509_v30 = vld [vmem:[%s4407_s0 + $0xe4] ss:$8 sps:$4 sm:$0xff]  }
  0xed   :  { %v2981_v32 = vpop.f32.mrb[8].mxu0 }
  0xee   :  { %v317_v33 = vpop.f32.mrb[9].mxu0 }
  0xef   :  { %v2982_v34 = vpop.f32.mrb[10].mxu0 }
  0xf0   :  { %v417_v35 = vpack.c.bf16 %v2982_v34, %v2981_v32  ;;  %v320_v36 = vpop.f32.mrb[11].mxu0  ;;  %v3521_v32 = vld [vmem:[%s4407_s0 + $0xf4] ss:$8 sps:$4 sm:$0xff]   ;;  %v3165_v34 = vld [vmem:[%s4408_s5] sm:$0xff]  }
  0xf1   :  { %v416_v37 = vpack.c.bf16 %v320_v36, %v317_v33  ;;  %v3528_v33 = vld [vmem:[%s4407_s0 + $0xf0] ss:$8 sps:$4 sm:$0xff]  }
  0xf2   :  { %v3167_v36 = vld [vmem:[%s4408_s5 + $0x10] sm:$0xff]  }
  0xf5   :  { %v2985_v38 = vpop.f32.mrb[12].mxu0 }
  0xf6   :  { %v333_v39 = vpop.f32.mrb[13].mxu0 }
  0xf7   :  { %v2986_v40 = vpop.f32.mrb[14].mxu0 }
  0xf8   :  { %v419_v41 = vpack.c.bf16 %v2986_v40, %v2985_v38  ;;  %v336_v42 = vpop.f32.mrb[15].mxu0  ;;  %v2337_v38 = vld [vmem:[%s4409_s4] sm:$0xff]  }
  0xf9   :  { %v418_v43 = vpack.c.bf16 %v336_v42, %v333_v39  ;;  %v2532_v39 = vld [vmem:[%s4409_s4 + $0x28] sm:$0xff]   ;;  %v2338_v40 = vunpack.c.l.bf16 %v2337_v38 }
  0xfd   :  { %v2989_v44 = vpop.f32.mrb[16].mxu0 }
  0xfe   :  { %v349_v45 = vpop.f32.mrb[17].mxu0 }
  0xff   :  { %v2990_v46 = vpop.f32.mrb[18].mxu0 }
 0x100   :  { %v421_v47 = vpack.c.bf16 %v2990_v46, %v2989_v44  ;;  %v352_v48 = vpop.f32.mrb[19].mxu0  ;;  %v3552_v44 = vld [vmem:[%s4410_s3] ss:$0 sm:$0xff]  ;;  %v2339_v46 = vunpack.c.h.bf16 %v2337_v38 }
 0x101   :  { %v420_v49 = vpack.c.bf16 %v352_v48, %v349_v45  ;;  %v2359_v48 = vunpack.c.h.bf16 %v2532_v39 }
 0x103   :  { %2591 = vmatprep.subr.bf16.mxu0 %v420_v49  ;;  %3083 = vmatprep.subr.bf16.mxu1 %v420_v49 }
 0x104   :  { %2592 = vmatpush3.bf16.msra.mxu0 %v412_v25  ;;  %3091 = vmatpush3.bf16.msra.mxu1 %v412_v25  ;;  %v3480_v25 = vld [vmem:[%s4407_s0 + $0xb0] ss:$8 sps:$4 sm:$0xff]  }
 0x105   :  { %v2993_v50 = vpop.f32.mrb[20].mxu0  ;;  %2593 = vmatprep.subr.bf16.mxu0 %v421_v47  ;;  %3084 = vmatprep.subr.bf16.mxu1 %v421_v47 }
 0x106   :  { %v365_v51 = vpop.f32.mrb[21].mxu0 }
 0x107   :  { %v2994_v52 = vpop.f32.mrb[22].mxu0 }
 0x108   :  { %v423_v53 = vpack.c.bf16 %v2994_v52, %v2993_v50  ;;  %v368_v54 = vpop.f32.mrb[23].mxu0  ;;  %2594 = vmatpush3.bf16.msra.mxu0 %v413_v23  ;;  %3092 = vmatpush3.bf16.msra.mxu1 %v413_v23  ;;  %v3468_v23 = vld [vmem:[%s4407_s0 + $0xa0] ss:$8 sps:$4 sm:$0xff]  }
 0x109   :  { %v422_v55 = vpack.c.bf16 %v368_v54, %v365_v51 }
 0x10b   :  { %2595 = vmatprep.subr.bf16.mxu0 %v422_v55  ;;  %3085 = vmatprep.subr.bf16.mxu1 %v422_v55 }
 0x10c   :  { %2596 = vmatpush3.bf16.msra.mxu0 %v414_v31  ;;  %3093 = vmatpush3.bf16.msra.mxu1 %v414_v31  ;;  %v3516_v31 = vld [vmem:[%s4407_s0 + $0xe0] ss:$8 sps:$4 sm:$0xff]  }
 0x10d   :  { %v2997_v56 = vpop.f32.mrb[24].mxu0  ;;  %2597 = vmatprep.subr.bf16.mxu0 %v423_v53  ;;  %3086 = vmatprep.subr.bf16.mxu1 %v423_v53  ;;  %v852_v53 = vmul.f32 1.4285715, %v2338_v40 }
 0x10e   :  { %v381_v57 = vpop.f32.mrb[25].mxu0 }
 0x10f   :  { %v2998_v58 = vpop.f32.mrb[26].mxu0 }
 0x110   :  { %v425_v59 = vpack.c.bf16 %v2998_v58, %v2997_v56  ;;  %v384_v60 = vpop.f32.mrb[27].mxu0  ;;  %2598 = vmatpush3.bf16.msra.mxu0 %v415_v29  ;;  %3094 = vmatpush3.bf16.msra.mxu1 %v415_v29  ;;  %v3504_v29 = vld [vmem:[%s4407_s0 + $0xd0] ss:$8 sps:$4 sm:$0xff]  }
 0x111   :  { %v424_v61 = vpack.c.bf16 %v384_v60, %v381_v57 }
 0x113   :  { %2599 = vmatprep.subr.bf16.mxu0 %v424_v61  ;;  %3087 = vmatprep.subr.bf16.mxu1 %v424_v61 }
 0x114   :  { %2600 = vmatpush3.bf16.msra.mxu0 %v416_v37  ;;  %3095 = vmatpush3.bf16.msra.mxu1 %v416_v37  ;;  %v3168_v37 = vld [vmem:[%s4408_s5 + $0x18] sm:$0xff]  }
 0x115   :  { %v3001_v62 = vpop.f32.mrb[28].mxu0  ;;  %2601 = vmatprep.subr.bf16.mxu0 %v425_v59  ;;  %3088 = vmatprep.subr.bf16.mxu1 %v425_v59  ;;  %v2528_v59 = vld [vmem:[%s4409_s4 + $0x8] sm:$0xff]  }
 0x116   :  { %v397_v63 = vpop.f32.mrb[29].mxu0 }
 0x117   :  { %v3002_v0 = vpop.f32.mrb[30].mxu0 }
 0x118   :  { %v427_v1 = vpack.c.bf16 %v3002_v0, %v3001_v62  ;;  %v400_v2 = vpop.f32.mrb[31].mxu0  ;;  %2602 = vmatpush3.bf16.msra.mxu0 %v417_v35  ;;  %3096 = vmatpush3.bf16.msra.mxu1 %v417_v35  ;;  %v3166_v35 = vld [vmem:[%s4408_s5 + $0x8] sm:$0xff]   ;;  %v853_v62 = vmul.f32 1.4285715, %v2339_v46 }
 0x119   :  { %v426_v3 = vpack.c.bf16 %v400_v2, %v397_v63  ;;  %v863_v63 = vmul.f32 1.4285715, %v2359_v48 }
 0x11b   :  { %2603 = vmatprep.subr.bf16.mxu0 %v426_v3  ;;  %3089 = vmatprep.subr.bf16.mxu1 %v426_v3 }
 0x11c   :  { %2604 = vmatpush3.bf16.msra.mxu0 %v418_v43  ;;  %3097 = vmatpush3.bf16.msra.mxu1 %v418_v43 }
 0x11d   :  { %2605 = vmatprep.subr.bf16.mxu0 %v427_v1  ;;  %3090 = vmatprep.subr.bf16.mxu1 %v427_v1 }
 0x120   :  { %2606 = vmatpush3.bf16.msra.mxu0 %v419_v41  ;;  %3098 = vmatpush3.bf16.msra.mxu1 %v419_v41  ;;  %v2358_v41 = vunpack.c.l.bf16 %v2532_v39 }
 0x121   :  { %3003 = vmatprep.subr.bf16.mxu0 %v3165_v34 }
 0x122   :  { %v862_v55 = vmul.f32 1.4285715, %v2358_v41 }
 0x123   :  { %628 = vmatmul.mubr.bf16.vlgmr.msra.gmra.mrb[32].mxu0 %v3354_v4  ;;  %668 = vmatmul.mubr.bf16.vlgmr.msra.gmra.mrb[0].mxu1 %v3359_v5 }
 0x124   :  { %635 = vmatprep.mubr.bf16.mxu0 %v3364_v6  ;;  %675 = vmatprep.mubr.bf16.mxu1 %v3369_v7 }
 0x125   :  { %3004 = vmatpush3.bf16.msra.mxu0 %v3165_v34  ;;  %v2533_v34 = vld [vmem:[%s4409_s4 + $0x30] sm:$0xff]  }
 0x126   :  { %3005 = vmatprep.subr.bf16.mxu0 %v3166_v35  ;;  %v2362_v46 = vunpack.c.l.bf16 %v2533_v34 }
 0x129   :  { %3006 = vmatpush3.bf16.msra.mxu0 %v3166_v35  ;;  %v2342_v35 = vunpack.c.l.bf16 %v2528_v59 }
 0x12a   :  { %3007 = vmatprep.subr.bf16.mxu0 %v3167_v36 }
 0x12b   :  { %636 = vmatmul.mubr.bf16.gmra.mrb[36].mxu0 %v3378_v8  ;;  %676 = vmatmul.mubr.bf16.gmra.mrb[4].mxu1 %v3383_v9 }
 0x12c   :  { %643 = vmatprep.mubr.bf16.mxu0 %v3388_v10  ;;  %683 = vmatprep.mubr.bf16.mxu1 %v3393_v11 }
 0x12d   :  { %3008 = vmatpush3.bf16.msra.mxu0 %v3167_v36 }
 0x12e   :  { %3009 = vmatprep.subr.bf16.mxu0 %v3168_v37 }
 0x131   :  { %3010 = vmatpush3.bf16.msra.mxu0 %v3168_v37 }
 0x133   :  { %644 = vmatmul.mubr.bf16.gmra.mrb[40].mxu0 %v3402_v12  ;;  %684 = vmatmul.mubr.bf16.gmra.mrb[8].mxu1 %v3407_v13 }
 0x134   :  { %651 = vmatprep.mubr.bf16.mxu0 %v3412_v14  ;;  %691 = vmatprep.mubr.bf16.mxu1 %v3417_v15 }
 0x13b   :  { %652 = vmatmul.mubr.bf16.gmra.mrb[44].mxu0 %v3426_v16  ;;  %692 = vmatmul.mubr.bf16.gmra.mrb[12].mxu1 %v3431_v17 }
 0x13c   :  { %659 = vmatprep.mubr.bf16.mxu0 %v3436_v18  ;;  %699 = vmatprep.mubr.bf16.mxu1 %v3441_v19 }
 0x143   :  { %660 = vmatmul.mubr.bf16.gmra.mrb[48].mxu0 %v3450_v20  ;;  %700 = vmatmul.mubr.bf16.gmra.mrb[16].mxu1 %v3455_v21 }
 0x144   :  { %707 = vmatprep.mubr.bf16.mxu1 %v3460_v22 }
 0x14b   :  { %708 = vmatmul.mubr.bf16.gmra.mrb[20].mxu1 %v3468_v23 }
 0x14c   :  { %715 = vmatprep.mubr.bf16.mxu1 %v3473_v24 }
 0x153   :  { %716 = vmatmul.mubr.bf16.gmra.mrb[24].mxu1 %v3480_v25 }
 0x154   :  { %723 = vmatprep.mubr.bf16.mxu1 %v3485_v26 }
 0x15b   :  { %724 = vmatmul.mubr.bf16.gmra.mrb[28].mxu1 %v3492_v27 }
 0x15c   :  { %731 = vmatprep.mubr.bf16.mxu1 %v3497_v28 }
 0x163   :  { %732 = vmatmul.mubr.bf16.gmra.mrb[32].mxu1 %v3504_v29 }
 0x164   :  { %739 = vmatprep.mubr.bf16.mxu1 %v3509_v30 }
 0x16b   :  { %740 = vmatmul.mubr.bf16.gmra.mrb[36].mxu1 %v3516_v31 }
 0x16c   :  { %747 = vmatprep.mubr.bf16.mxu1 %v3521_v32 }
 0x173   :  { %748 = vmatmul.mubr.bf16.gmra.mrb[40].mxu1 %v3528_v33 }
 0x1f6   :  { %v2607_v42 = vpop.f32.mrb[32].mxu0  ;;  %v2637_v43 = vpop.f32.mrb[0].mxu1 }
 0x1f7   :  { %v2608_v45 = vpop.f32.mrb[33].mxu0  ;;  %v2638_v47 = vpop.f32.mrb[1].mxu1 }
 0x1f8   :  { %v2609_v49 = vadd.f32 %v2608_v45, %v2607_v42  ;;  %v2610_v50 = vpop.f32.mrb[34].mxu0  ;;  %v2639_v51 = vadd.f32 %v2638_v47, %v2637_v43  ;;  %v2640_v52 = vpop.f32.mrb[2].mxu1  ;;  %v2343_v43 = vunpack.c.h.bf16 %v2528_v59  ;;  %v2363_v47 = vunpack.c.h.bf16 %v2533_v34 }
 0x1f9   :  { %v2611_v54 = vpop.f32.mrb[35].mxu0  ;;  %v2641_v56 = vpop.f32.mrb[3].mxu1 }
 0x1fa   :  { %v630_v57 = vadd.f32 %v2609_v49, %v3552_v44  ;;  %v2612_v58 = vadd.f32 %v2611_v54, %v2610_v50  ;;  %v670_v60 = vadd.f32 %v2639_v51, %v3552_v44  ;;  %v2642_v61 = vadd.f32 %v2641_v56, %v2640_v52 }
 0x1fb   :  { %v854_v54 = vmul.f32 1.4285715, %v2342_v35  ;;  %v855_v34 = vmul.f32 1.4285715, %v2343_v43  ;;  %v865_v35 = vmul.f32 1.4285715, %v2363_v47 }
 0x1fc   :  { %v756_v0 = vmax.f32 %v630_v57, 0.0  ;;  %v633_v1 = vadd.f32 %v2612_v58, %v3552_v44  ;;  %v766_v2 = vmax.f32 %v670_v60, 0.0  ;;  %v673_v3 = vadd.f32 %v2642_v61, %v3552_v44  ;;  %v2529_v60 = vld [vmem:[%s4409_s4 + $0x10] sm:$0xff]  }
 0x1fe   :  { %v884_v36 = vmul.f32 %v852_v53, %v756_v0  ;;  %v757_v37 = vmax.f32 %v633_v1, 0.0  ;;  %v2613_v38 = vpop.f32.mrb[36].mxu0  ;;  %v3564_v39 = vmul.f32 %v862_v55, %v766_v2  ;;  %v767_v40 = vmax.f32 %v673_v3, 0.0  ;;  %v2643_v41 = vpop.f32.mrb[4].mxu1 }
 0x1ff   :  { %v2614_v42 = vpop.f32.mrb[37].mxu0  ;;  %v2644_v45 = vpop.f32.mrb[5].mxu1  ;;  %v864_v0 = vmul.f32 1.4285715, %v2362_v46 }
 0x200   :  { %917 = vst.msk [vmem:[%s4411_s11] sm:$0xff] %vm916_vm1, %v884_v36  ;;  %v885_v48 = vmul.f32 %v853_v62, %v757_v37  ;;  %v2615_v49 = vadd.f32 %v2614_v42, %v2613_v38  ;;  %v2616_v50 = vpop.f32.mrb[38].mxu0  ;;  %927 = vst.msk [vmem:[%s4411_s11 + $0x50] sm:$0xff] %vm916_vm1, %v3564_v39  ;;  %v3575_v51 = vmul.f32 %v863_v63, %v767_v40  ;;  %v2646_v53 = vpop.f32.mrb[6].mxu1  ;;  %v2534_v62 = vld [vmem:[%s4409_s4 + $0x38] sm:$0xff]  }
 0x201   :  { %v2645_v52 = vadd.f32 %v2644_v45, %v2643_v41  ;;  %v2617_v55 = vpop.f32.mrb[39].mxu0  ;;  %v2647_v56 = vpop.f32.mrb[7].mxu1  ;;  %v2366_v40 = vunpack.c.l.bf16 %v2534_v62 }
 0x202   :  { %918 = vst.msk [vmem:[%s4411_s11 + $0x8] sm:$0xff] %vm916_vm1, %v885_v48  ;;  %v949_v57 = vpack.c.bf16 %v885_v48, %v884_v36  ;;  %v638_v58 = vadd.f32 %v2615_v49, %v3552_v44  ;;  %v2618_v59 = vadd.f32 %v2617_v55, %v2616_v50  ;;  %928 = vst.msk [vmem:[%s4411_s11 + $0x58] sm:$0xff] %vm916_vm1, %v3575_v51  ;;  %v2346_v36 = vunpack.c.l.bf16 %v2529_v60 }
 0x203   :  { %v678_v63 = vadd.f32 %v2645_v52, %v3552_v44  ;;  %v2648_v1 = vadd.f32 %v2647_v56, %v2646_v53  ;;  %v2347_v55 = vunpack.c.h.bf16 %v2529_v60 }
 0x204   :  { %v758_v2 = vmax.f32 %v638_v58, 0.0  ;;  %v641_v3 = vadd.f32 %v2618_v59, %v3552_v44  ;;  %3011 = vmatprep.mubr.msk.bf16.mxu0 %vm916_vm1, %v949_v57 }
 0x205   :  { %v768_v37 = vmax.f32 %v678_v63, 0.0  ;;  %v681_v38 = vadd.f32 %v2648_v1, %v3552_v44  ;;  %v866_v63 = vmul.f32 1.4285715, %v2366_v40  ;;  %v2367_v1 = vunpack.c.h.bf16 %v2534_v62 }
 0x206   :  { %v886_v41 = vmul.f32 %v854_v54, %v758_v2  ;;  %v759_v42 = vmax.f32 %v641_v3, 0.0  ;;  %v2619_v45 = vpop.f32.mrb[40].mxu0  ;;  %v2649_v48 = vpop.f32.mrb[8].mxu1  ;;  %v856_v54 = vmul.f32 1.4285715, %v2346_v36 }
 0x207   :  { %v2620_v49 = vpop.f32.mrb[41].mxu0  ;;  %v3599_v50 = vmul.f32 %v864_v0, %v768_v37  ;;  %v769_v46 = vmax.f32 %v681_v38, 0.0  ;;  %v2650_v52 = vpop.f32.mrb[9].mxu1 }
 0x208   :  { %919 = vst.msk [vmem:[%s4411_s11 + $0x10] sm:$0xff] %vm916_vm1, %v886_v41  ;;  %v887_v43 = vmul.f32 %v855_v34, %v759_v42  ;;  %v2621_v47 = vadd.f32 %v2620_v49, %v2619_v45  ;;  %v2622_v53 = vpop.f32.mrb[42].mxu0  ;;  %v2651_v56 = vadd.f32 %v2650_v52, %v2649_v48  ;;  %v2652_v57 = vpop.f32.mrb[10].mxu1  ;;  %v2530_v34 = vld [vmem:[%s4409_s4 + $0x18] sm:$0xff]   ;;  %v867_v49 = vmul.f32 1.4285715, %v2367_v1 }
 0x209   :  { %v2623_v58 = vpop.f32.mrb[43].mxu0  ;;  %929 = vst.msk [vmem:[%s4411_s11 + $0x60] sm:$0xff] %vm916_vm1, %v3599_v50  ;;  %v3610_v59 = vmul.f32 %v865_v35, %v769_v46  ;;  %v2653_v0 = vpop.f32.mrb[11].mxu1  ;;  %v2535_v35 = vld [vmem:[%s4409_s4 + $0x40] sm:$0xff]   ;;  %v2350_v45 = vunpack.c.l.bf16 %v2530_v34 }
 0x20a   :  { %920 = vst.msk [vmem:[%s4411_s11 + $0x18] sm:$0xff] %vm916_vm1, %v887_v43  ;;  %v950_v60 = vpack.c.bf16 %v887_v43, %v886_v41  ;;  %v646_v2 = vadd.f32 %v2621_v47, %v3552_v44  ;;  %v2624_v3 = vadd.f32 %v2623_v58, %v2622_v53  ;;  %v686_v36 = vadd.f32 %v2651_v56, %v3552_v44 }
 0x20b   :  { %930 = vst.msk [vmem:[%s4411_s11 + $0x68] sm:$0xff] %vm916_vm1, %v3610_v59  ;;  %v2654_v37 = vadd.f32 %v2653_v0, %v2652_v57  ;;  %v857_v41 = vmul.f32 1.4285715, %v2347_v55  ;;  %v2370_v46 = vunpack.c.l.bf16 %v2535_v35  ;;  %v858_v1 = vmul.f32 1.4285715, %v2350_v45 }
 0x20c   :  { %v760_v38 = vmax.f32 %v646_v2, 0.0  ;;  %v649_v40 = vadd.f32 %v2624_v3, %v3552_v44  ;;  %3012 = vmatmul.mubr.msk.bf16.vlgmr.msra.gmra.mrb[52].mxu0 %vm916_vm1, %v950_v60  ;;  %v770_v42 = vmax.f32 %v686_v36, 0.0  ;;  %v2351_v3 = vunpack.c.h.bf16 %v2530_v34 }
 0x20d   :  { %v689_v48 = vadd.f32 %v2654_v37, %v3552_v44 }
 0x20e   :  { %v888_v52 = vmul.f32 %v856_v54, %v760_v38  ;;  %v761_v43 = vmax.f32 %v649_v40, 0.0  ;;  %v2625_v47 = vpop.f32.mrb[44].mxu0  ;;  %v3634_v53 = vmul.f32 %v866_v63, %v770_v42  ;;  %v2655_v56 = vpop.f32.mrb[12].mxu1  ;;  %v868_v38 = vmul.f32 1.4285715, %v2370_v46 }
 0x20f   :  { %v2626_v58 = vpop.f32.mrb[45].mxu0  ;;  %v771_v57 = vmax.f32 %v689_v48, 0.0  ;;  %v2656_v0 = vpop.f32.mrb[13].mxu1  ;;  %v2371_v42 = vunpack.c.h.bf16 %v2535_v35 }
 0x210   :  { %921 = vst.msk [vmem:[%s4411_s11 + $0x20] sm:$0xff] %vm916_vm1, %v888_v52  ;;  %v889_v55 = vmul.f32 %v857_v41, %v761_v43  ;;  %v2627_v60 = vadd.f32 %v2626_v58, %v2625_v47  ;;  %v2628_v2 = vpop.f32.mrb[46].mxu0  ;;  %931 = vst.msk [vmem:[%s4411_s11 + $0x70] sm:$0xff] %vm916_vm1, %v3634_v53  ;;  %v2657_v54 = vadd.f32 %v2656_v0, %v2655_v56  ;;  %v2658_v63 = vpop.f32.mrb[14].mxu1  ;;  %v2531_v43 = vld [vmem:[%s4409_s4 + $0x20] sm:$0xff]  }
 0x211   :  { %v2629_v36 = vpop.f32.mrb[47].mxu0  ;;  %v3645_v37 = vmul.f32 %v867_v49, %v771_v57  ;;  %v2659_v40 = vpop.f32.mrb[15].mxu1  ;;  %v2536_v49 = vld [vmem:[%s4409_s4 + $0x48] sm:$0xff]   ;;  %v859_v56 = vmul.f32 1.4285715, %v2351_v3  ;;  %v2354_v57 = vunpack.c.l.bf16 %v2531_v43 }
 0x212   :  { %922 = vst.msk [vmem:[%s4411_s11 + $0x28] sm:$0xff] %vm916_vm1, %v889_v55  ;;  %v951_v34 = vpack.c.bf16 %v889_v55, %v888_v52  ;;  %v654_v41 = vadd.f32 %v2627_v60, %v3552_v44  ;;  %v2630_v48 = vadd.f32 %v2629_v36, %v2628_v2  ;;  %v694_v45 = vadd.f32 %v2657_v54, %v3552_v44 }
 0x213   :  { %932 = vst.msk [vmem:[%s4411_s11 + $0x78] sm:$0xff] %vm916_vm1, %v3645_v37  ;;  %v2660_v46 = vadd.f32 %v2659_v40, %v2658_v63  ;;  %v869_v55 = vmul.f32 1.4285715, %v2371_v42  ;;  %v2374_v60 = vunpack.c.l.bf16 %v2536_v49  ;;  %v860_v42 = vmul.f32 1.4285715, %v2354_v57  ;;  %v2537_v57 = vld [vmem:[%s4409_s4 + $0x50] sm:$0xff]  }
 0x214   :  { %v762_v52 = vmax.f32 %v654_v41, 0.0  ;;  %v657_v47 = vadd.f32 %v2630_v48, %v3552_v44  ;;  %3015 = vmatprep.mubr.msk.bf16.mxu0 %vm916_vm1, %v951_v34  ;;  %v772_v58 = vmax.f32 %v694_v45, 0.0  ;;  %v2355_v48 = vunpack.c.h.bf16 %v2531_v43 }
 0x215   :  { %v697_v0 = vadd.f32 %v2660_v46, %v3552_v44 }
 0x216   :  { %v890_v2 = vmul.f32 %v858_v1, %v762_v52  ;;  %v763_v54 = vmax.f32 %v657_v47, 0.0  ;;  %v2631_v36 = vpop.f32.mrb[48].mxu0  ;;  %v3669_v62 = vmul.f32 %v868_v38, %v772_v58  ;;  %v2661_v61 = vpop.f32.mrb[16].mxu1  ;;  %v870_v52 = vmul.f32 1.4285715, %v2374_v60 }
 0x217   :  { %v2632_v35 = vpop.f32.mrb[49].mxu0  ;;  %v773_v63 = vmax.f32 %v697_v0, 0.0  ;;  %v2662_v40 = vpop.f32.mrb[17].mxu1  ;;  %v2375_v58 = vunpack.c.h.bf16 %v2536_v49 }
 0x218   :  { %923 = vst.msk [vmem:[%s4411_s11 + $0x30] sm:$0xff] %vm916_vm1, %v890_v2  ;;  %v891_v3 = vmul.f32 %v859_v56, %v763_v54  ;;  %v2633_v34 = vadd.f32 %v2632_v35, %v2631_v36  ;;  %v2634_v41 = vpop.f32.mrb[50].mxu0  ;;  %933 = vst.msk [vmem:[%s4411_s11 + $0x80] sm:$0xff] %vm916_vm1, %v3669_v62  ;;  %v2663_v1 = vadd.f32 %v2662_v40, %v2661_v61  ;;  %v2664_v38 = vpop.f32.mrb[18].mxu1 }
 0x219   :  { %v2635_v45 = vpop.f32.mrb[51].mxu0  ;;  %v3680_v46 = vmul.f32 %v869_v55, %v773_v63  ;;  %v2665_v47 = vpop.f32.mrb[19].mxu1  ;;  %v871_v63 = vmul.f32 1.4285715, %v2375_v58 }
 0x21a   :  { %924 = vst.msk [vmem:[%s4411_s11 + $0x38] sm:$0xff] %vm916_vm1, %v891_v3  ;;  %v952_v43 = vpack.c.bf16 %v891_v3, %v890_v2  ;;  %v662_v35 = vadd.f32 %v2633_v34, %v3552_v44  ;;  %v2636_v56 = vadd.f32 %v2635_v45, %v2634_v41  ;;  %v702_v0 = vadd.f32 %v2663_v1, %v3552_v44 }
 0x21b   :  { %934 = vst.msk [vmem:[%s4411_s11 + $0x88] sm:$0xff] %vm916_vm1, %v3680_v46  ;;  %v957_v61 = vpack.c.bf16 %v3680_v46, %v3669_v62  ;;  %v2666_v49 = vadd.f32 %v2665_v47, %v2664_v38  ;;  %v861_v2 = vmul.f32 1.4285715, %v2355_v48  ;;  %v2378_v41 = vunpack.c.l.bf16 %v2537_v57 }
 0x21c   :  { %v764_v55 = vmax.f32 %v662_v35, 0.0  ;;  %v665_v60 = vadd.f32 %v2636_v56, %v3552_v44  ;;  %3016 = vmatmul.mubr.msk.bf16.gmra.mrb[56].mxu0 %vm916_vm1, %v952_v43  ;;  %v774_v54 = vmax.f32 %v702_v0, 0.0  ;;  %v2379_v46 = vunpack.c.h.bf16 %v2537_v57 }
 0x21d   :  { %v705_v36 = vadd.f32 %v2666_v49, %v3552_v44  ;;  %v872_v35 = vmul.f32 1.4285715, %v2378_v41  ;;  %v2538_v49 = vld [vmem:[%s4409_s4 + $0x58] sm:$0xff]  }
 0x21e   :  { %v892_v40 = vmul.f32 %v860_v42, %v764_v55  ;;  %v765_v3 = vmax.f32 %v665_v60, 0.0  ;;  %v3701_v34 = vmul.f32 %v870_v52, %v774_v54  ;;  %v2667_v62 = vpop.f32.mrb[20].mxu1  ;;  %v873_v60 = vmul.f32 1.4285715, %v2379_v46 }
 0x21f   :  { %v775_v1 = vmax.f32 %v705_v36, 0.0  ;;  %v2668_v38 = vpop.f32.mrb[21].mxu1  ;;  %v4420_v54 = vpack.c.bf16 %v3610_v59, %v3599_v50 }
 0x220   :  { %925 = vst.msk [vmem:[%s4411_s11 + $0x40] sm:$0xff] %vm916_vm1, %v892_v40  ;;  %v893_v48 = vmul.f32 %v861_v2, %v765_v3  ;;  %935 = vst.msk [vmem:[%s4411_s11 + $0x90] sm:$0xff] %vm916_vm1, %v3701_v34  ;;  %v2669_v42 = vadd.f32 %v2668_v38, %v2667_v62  ;;  %v2670_v45 = vpop.f32.mrb[22].mxu1  ;;  %v4419_v2 = vpack.c.bf16 %v3575_v51, %v3564_v39  ;;  %v2382_v3 = vunpack.c.l.bf16 %v2538_v49 }
 0x221   :  { %v903_v52 = vmul.f32 %v871_v63, %v775_v1  ;;  %v2671_v47 = vpop.f32.mrb[23].mxu1  ;;  %v2383_v51 = vunpack.c.h.bf16 %v2538_v49 }
 0x222   :  { %926 = vst.msk [vmem:[%s4411_s11 + $0x48] sm:$0xff] %vm916_vm1, %v893_v48  ;;  %v953_v58 = vpack.c.bf16 %v893_v48, %v892_v40  ;;  %v710_v43 = vadd.f32 %v2669_v42, %v3552_v44  ;;  %v2672_v56 = vadd.f32 %v2671_v47, %v2670_v45  ;;  %v874_v38 = vmul.f32 1.4285715, %v2382_v3  ;;  %v2539_v42 = vld [vmem:[%s4409_s4 + $0x60] sm:$0xff]  }
 0x223   :  { %936 = vst.msk [vmem:[%s4411_s11 + $0x98] sm:$0xff] %vm916_vm1, %v903_v52  ;;  %v958_v0 = vpack.c.bf16 %v903_v52, %v3701_v34  ;;  %v875_v52 = vmul.f32 1.4285715, %v2383_v51  ;;  %v4421_v47 = vpack.c.bf16 %v3645_v37, %v3634_v53 }
 0x224   :  { %3019 = vmatprep.mubr.msk.bf16.mxu0 %vm916_vm1, %v953_v58  ;;  %v776_v57 = vmax.f32 %v710_v43, 0.0  ;;  %v713_v55 = vadd.f32 %v2672_v56, %v3552_v44  ;;  %v2386_v56 = vunpack.c.l.bf16 %v2539_v42 }
 0x225   :  { %3020 = vmatmul.mubr.msk.bf16.gmra.mrb[60].mxu0 %vm916_vm1, %v4419_v2  ;;  %v2387_v2 = vunpack.c.h.bf16 %v2539_v42 }
 0x226   :  { %3023 = vmatprep.mubr.msk.bf16.mxu0 %vm916_vm1, %v4420_v54  ;;  %v904_v36 = vmul.f32 %v872_v35, %v776_v57  ;;  %v777_v63 = vmax.f32 %v713_v55, 0.0  ;;  %v2673_v40 = vpop.f32.mrb[24].mxu1 }
 0x227   :  { %v2674_v34 = vpop.f32.mrb[25].mxu1 }
 0x228   :  { %937 = vst.msk [vmem:[%s4411_s11 + $0xa0] sm:$0xff] %vm916_vm1, %v904_v36  ;;  %v905_v62 = vmul.f32 %v873_v60, %v777_v63  ;;  %v2675_v41 = vadd.f32 %v2674_v34, %v2673_v40  ;;  %v2676_v39 = vpop.f32.mrb[26].mxu1  ;;  %v2540_v63 = vld [vmem:[%s4409_s4 + $0x68] sm:$0xff]   ;;  %v877_v34 = vmul.f32 1.4285715, %v2387_v2 }
 0x229   :  { %v2677_v1 = vpop.f32.mrb[27].mxu1  ;;  %v2390_v51 = vunpack.c.l.bf16 %v2540_v63  ;;  %v2391_v42 = vunpack.c.h.bf16 %v2540_v63 }
 0x22a   :  { %938 = vst.msk [vmem:[%s4411_s11 + $0xa8] sm:$0xff] %vm916_vm1, %v905_v62  ;;  %v959_v50 = vpack.c.bf16 %v905_v62, %v904_v36  ;;  %v718_v59 = vadd.f32 %v2675_v41, %v3552_v44  ;;  %v2678_v48 = vadd.f32 %v2677_v1, %v2676_v39 }
 0x22c   :  { %v778_v45 = vmax.f32 %v718_v59, 0.0  ;;  %v721_v46 = vadd.f32 %v2678_v48, %v3552_v44 }
 0x22d   :  { %3024 = vmatmul.mubr.msk.bf16.gmra.mrb[64].mxu0 %vm916_vm1, %v4421_v47  ;;  %v2541_v47 = vld [vmem:[%s4409_s4 + $0x70] sm:$0xff]  }
 0x22e   :  { %3027 = vmatprep.mubr.msk.bf16.mxu0 %vm916_vm1, %v957_v61  ;;  %v906_v58 = vmul.f32 %v874_v38, %v778_v45  ;;  %v779_v43 = vmax.f32 %v721_v46, 0.0  ;;  %v2679_v35 = vpop.f32.mrb[28].mxu1  ;;  %v876_v61 = vmul.f32 1.4285715, %v2386_v56 }
 0x22f   :  { %v2680_v49 = vpop.f32.mrb[29].mxu1 }
 0x230   :  { %939 = vst.msk [vmem:[%s4411_s11 + $0xb0] sm:$0xff] %vm916_vm1, %v906_v58  ;;  %v907_v57 = vmul.f32 %v875_v52, %v779_v43  ;;  %v2681_v55 = vadd.f32 %v2680_v49, %v2679_v35  ;;  %v2682_v60 = vpop.f32.mrb[30].mxu1  ;;  %v879_v35 = vmul.f32 1.4285715, %v2391_v42 }
 0x231   :  { %v2683_v54 = vpop.f32.mrb[31].mxu1 }
 0x232   :  { %940 = vst.msk [vmem:[%s4411_s11 + $0xb8] sm:$0xff] %vm916_vm1, %v907_v57  ;;  %v960_v53 = vpack.c.bf16 %v907_v57, %v906_v58  ;;  %v726_v37 = vadd.f32 %v2681_v55, %v3552_v44  ;;  %v2684_v36 = vadd.f32 %v2683_v54, %v2682_v60  ;;  %v2394_v55 = vunpack.c.l.bf16 %v2541_v47 }
 0x234   :  { %v780_v40 = vmax.f32 %v726_v37, 0.0  ;;  %v729_v3 = vadd.f32 %v2684_v36, %v3552_v44 }
 0x235   :  { %3028 = vmatmul.mubr.msk.bf16.gmra.mrb[68].mxu0 %vm916_vm1, %v958_v0 }
 0x236   :  { %v908_v62 = vmul.f32 %v876_v61, %v780_v40  ;;  %v781_v41 = vmax.f32 %v729_v3, 0.0  ;;  %v2685_v39 = vpop.f32.mrb[32].mxu1  ;;  %3031 = vmatprep.mubr.msk.bf16.mxu0 %vm916_vm1, %v959_v50  ;;  %v878_v50 = vmul.f32 1.4285715, %v2390_v51  ;;  %v2395_v61 = vunpack.c.h.bf16 %v2541_v47 }
 0x237   :  { %v2686_v1 = vpop.f32.mrb[33].mxu1  ;;  %v880_v40 = vmul.f32 1.4285715, %v2394_v55 }
 0x238   :  { %941 = vst.msk [vmem:[%s4411_s11 + $0xc0] sm:$0xff] %vm916_vm1, %v908_v62  ;;  %v909_v59 = vmul.f32 %v877_v34, %v781_v41  ;;  %v2687_v38 = vadd.f32 %v2686_v1, %v2685_v39  ;;  %v2688_v48 = vpop.f32.mrb[34].mxu1  ;;  %v2542_v34 = vld [vmem:[%s4409_s4 + $0x78] sm:$0xff]   ;;  %v881_v39 = vmul.f32 1.4285715, %v2395_v61 }
 0x239   :  { %v2689_v45 = vpop.f32.mrb[35].mxu1 }
 0x23a   :  { %942 = vst.msk [vmem:[%s4411_s11 + $0xc8] sm:$0xff] %vm916_vm1, %v909_v59  ;;  %v961_v0 = vpack.c.bf16 %v909_v59, %v908_v62  ;;  %v734_v46 = vadd.f32 %v2687_v38, %v3552_v44  ;;  %v2690_v52 = vadd.f32 %v2689_v45, %v2688_v48  ;;  %v2398_v38 = vunpack.c.l.bf16 %v2542_v34 }
 0x23c   :  { %v782_v58 = vmax.f32 %v734_v46, 0.0  ;;  %v737_v43 = vadd.f32 %v2690_v52, %v3552_v44  ;;  %v2399_v46 = vunpack.c.h.bf16 %v2542_v34 }
 0x23d   :  { %3032 = vmatmul.mubr.msk.bf16.gmra.mrb[72].mxu0 %vm916_vm1, %v960_v53 }
 0x23e   :  { %v910_v56 = vmul.f32 %v878_v50, %v782_v58  ;;  %v783_v49 = vmax.f32 %v737_v43, 0.0  ;;  %v2691_v57 = vpop.f32.mrb[36].mxu1  ;;  %3035 = vmatprep.mubr.msk.bf16.mxu0 %vm916_vm1, %v961_v0  ;;  %v882_v58 = vmul.f32 1.4285715, %v2398_v38 }
 0x23f   :  { %v2692_v60 = vpop.f32.mrb[37].mxu1 }
 0x240   :  { %943 = vst.msk [vmem:[%s4411_s11 + $0xd0] sm:$0xff] %vm916_vm1, %v910_v56  ;;  %v911_v2 = vmul.f32 %v879_v35, %v783_v49  ;;  %v2693_v54 = vadd.f32 %v2692_v60, %v2691_v57  ;;  %v2694_v37 = vpop.f32.mrb[38].mxu1  ;;  %v883_v49 = vmul.f32 1.4285715, %v2399_v46 }
 0x241   :  { %v2695_v36 = vpop.f32.mrb[39].mxu1 }
 0x242   :  { %944 = vst.msk [vmem:[%s4411_s11 + $0xd8] sm:$0xff] %vm916_vm1, %v911_v2  ;;  %v962_v53 = vpack.c.bf16 %v911_v2, %v910_v56  ;;  %v742_v63 = vadd.f32 %v2693_v54, %v3552_v44  ;;  %v2696_v3 = vadd.f32 %v2695_v36, %v2694_v37 }
 0x244   :  { %v784_v62 = vmax.f32 %v742_v63, 0.0  ;;  %v745_v41 = vadd.f32 %v2696_v3, %v3552_v44 }
 0x245   :  { %3036 = vmatmul.mubr.msk.bf16.gmra.mrb[76].mxu0 %vm916_vm1, %v962_v53 }
 0x246   :  { %v912_v51 = vmul.f32 %v880_v40, %v784_v62  ;;  %v785_v1 = vmax.f32 %v745_v41, 0.0  ;;  %v2697_v59 = vpop.f32.mrb[40].mxu1 }
 0x247   :  { %v2698_v48 = vpop.f32.mrb[41].mxu1 }
 0x248   :  { %945 = vst.msk [vmem:[%s4411_s11 + $0xe0] sm:$0xff] %vm916_vm1, %v912_v51  ;;  %v913_v42 = vmul.f32 %v881_v39, %v785_v1  ;;  %v2699_v45 = vadd.f32 %v2698_v48, %v2697_v59  ;;  %v2700_v0 = vpop.f32.mrb[42].mxu1 }
 0x249   :  { %v2701_v50 = vpop.f32.mrb[43].mxu1 }
 0x24a   :  { %946 = vst.msk [vmem:[%s4411_s11 + $0xe8] sm:$0xff] %vm916_vm1, %v913_v42  ;;  %v963_v52 = vpack.c.bf16 %v913_v42, %v912_v51  ;;  %v750_v47 = vadd.f32 %v2699_v45, %v3552_v44  ;;  %v2702_v43 = vadd.f32 %v2701_v50, %v2700_v0 }
 0x24c   :  { %v786_v35 = vmax.f32 %v750_v47, 0.0  ;;  %v753_v56 = vadd.f32 %v2702_v43, %v3552_v44  ;;  %3039 = vmatprep.mubr.msk.bf16.mxu0 %vm916_vm1, %v963_v52  ;;  %v3820_v44 = vld [vmem:[%s4407_s0 + $0x4] ss:$8 sps:$4 sm:$0xff]  }
 0x24e   :  { %v914_v57 = vmul.f32 %v882_v58, %v786_v35  ;;  %v787_v55 = vmax.f32 %v753_v56, 0.0 }
 0x250   :  { %947 = vst.msk [vmem:[%s4411_s11 + $0xf0] sm:$0xff] %vm916_vm1, %v914_v57  ;;  %v915_v60 = vmul.f32 %v883_v49, %v787_v55 }
 0x252   :  { %948 = vst.msk [vmem:[%s4411_s11 + $0xf8] sm:$0xff] %vm916_vm1, %v915_v60  ;;  %v964_v2 = vpack.c.bf16 %v915_v60, %v914_v57 }
 0x254   :  { %3040 = vmatmul.mubr.msk.bf16.gmra.mrb[80].mxu0 %vm916_vm1, %v964_v2 }
 0x255   :  { %1261 = vmatprep.mubr.bf16.mxu0 %v3820_v44 }
 0x2df   :  { %v3013_v54 = vpop.f32.mrb[52].mxu0 }
 0x2e0   :  { %v1079_v37 = vpop.f32.mrb[53].mxu0 }
 0x2e1   :  { %v3014_v61 = vpop.f32.mrb[54].mxu0 }
 0x2e2   :  { %v1207_v36 = vpack.c.bf16 %v3014_v61, %v3013_v54  ;;  %v1082_v53 = vpop.f32.mrb[55].mxu0 }
 0x2e3   :  { %v1206_v63 = vpack.c.bf16 %v1082_v53, %v1079_v37 }
 0x2ef   :  { %v3017_v40 = vpop.f32.mrb[56].mxu0 }
 0x2f0   :  { %v1095_v3 = vpop.f32.mrb[57].mxu0 }
 0x2f1   :  { %v3018_v34 = vpop.f32.mrb[58].mxu0 }
 0x2f2   :  { %v1209_v62 = vpack.c.bf16 %v3018_v34, %v3017_v40  ;;  %v1098_v41 = vpop.f32.mrb[59].mxu0 }
 0x2f3   :  { %v1208_v39 = vpack.c.bf16 %v1098_v41, %v1095_v3 }
 0x2f8   :  { %v3021_v51 = vpop.f32.mrb[60].mxu0 }
 0x2f9   :  { %v1111_v1 = vpop.f32.mrb[61].mxu0 }
 0x2fa   :  { %v3022_v59 = vpop.f32.mrb[62].mxu0 }
 0x2fb   :  { %v1211_v38 = vpack.c.bf16 %v3022_v59, %v3021_v51  ;;  %v1114_v48 = vpop.f32.mrb[63].mxu0 }
 0x2fc   :  { %v1210_v42 = vpack.c.bf16 %v1114_v48, %v1111_v1 }
 0x300   :  { %v3025_v45 = vpop.f32.mrb[64].mxu0 }
 0x301   :  { %v1127_v0 = vpop.f32.mrb[65].mxu0 }
 0x302   :  { %v3026_v46 = vpop.f32.mrb[66].mxu0 }
 0x303   :  { %v1213_v50 = vpack.c.bf16 %v3026_v46, %v3025_v45  ;;  %v1130_v52 = vpop.f32.mrb[67].mxu0  ;;  %v2544_v46 = vld [vmem:[%s4413_s7 + $0x10] sm:$0xff]  }
 0x304   :  { %v1212_v47 = vpack.c.bf16 %v1130_v52, %v1127_v0 }
 0x308   :  { %v3029_v58 = vpop.f32.mrb[68].mxu0 }
 0x309   :  { %v1143_v43 = vpop.f32.mrb[69].mxu0 }
 0x30a   :  { %v3030_v35 = vpop.f32.mrb[70].mxu0 }
 0x30b   :  { %v1215_v56 = vpack.c.bf16 %v3030_v35, %v3029_v58  ;;  %v1146_v49 = vpop.f32.mrb[71].mxu0 }
 0x30c   :  { %v1214_v57 = vpack.c.bf16 %v1146_v49, %v1143_v43 }
 0x30e   :  { %2723 = vmatprep.subr.bf16.mxu0 %v1214_v57 }
 0x30f   :  { %2724 = vmatpush3.bf16.msra.mxu0 %v1206_v63 }
 0x310   :  { %v3033_v55 = vpop.f32.mrb[72].mxu0  ;;  %2725 = vmatprep.subr.bf16.mxu0 %v1215_v56  ;;  %v2410_v56 = vunpack.c.l.bf16 %v2544_v46 }
 0x311   :  { %v1159_v60 = vpop.f32.mrb[73].mxu0 }
 0x312   :  { %v3034_v2 = vpop.f32.mrb[74].mxu0 }
 0x313   :  { %v1217_v54 = vpack.c.bf16 %v3034_v2, %v3033_v55  ;;  %v1162_v37 = vpop.f32.mrb[75].mxu0  ;;  %2726 = vmatpush3.bf16.msra.mxu0 %v1207_v36  ;;  %v2411_v2 = vunpack.c.h.bf16 %v2544_v46 }
 0x314   :  { %v1216_v61 = vpack.c.bf16 %v1162_v37, %v1159_v60 }
 0x316   :  { %2727 = vmatprep.subr.bf16.mxu0 %v1216_v61 }
 0x317   :  { %2728 = vmatpush3.bf16.msra.mxu0 %v1208_v39 }
 0x318   :  { %v3037_v53 = vpop.f32.mrb[76].mxu0  ;;  %2729 = vmatprep.subr.bf16.mxu0 %v1217_v54 }
 0x319   :  { %v1175_v40 = vpop.f32.mrb[77].mxu0 }
 0x31a   :  { %v3038_v3 = vpop.f32.mrb[78].mxu0 }
 0x31b   :  { %v1219_v34 = vpack.c.bf16 %v3038_v3, %v3037_v53  ;;  %v1178_v41 = vpop.f32.mrb[79].mxu0  ;;  %2730 = vmatpush3.bf16.msra.mxu0 %v1209_v62  ;;  %v1490_v53 = vmul.f32 1.4285715, %v2410_v56  ;;  %v2545_v3 = vld [vmem:[%s4413_s7 + $0x18] sm:$0xff]  }
 0x31c   :  { %v1218_v51 = vpack.c.bf16 %v1178_v41, %v1175_v40 }
 0x31e   :  { %2731 = vmatprep.subr.bf16.mxu0 %v1218_v51  ;;  %v1491_v51 = vmul.f32 1.4285715, %v2411_v2 }
 0x31f   :  { %2732 = vmatpush3.bf16.msra.mxu0 %v1210_v42 }
 0x320   :  { %2733 = vmatprep.subr.bf16.mxu0 %v1219_v34 }
 0x323   :  { %2734 = vmatpush3.bf16.msra.mxu0 %v1211_v38 }
 0x327   :  { %v3041_v63 = vpop.f32.mrb[80].mxu0 }
 0x328   :  { %v1191_v1 = vpop.f32.mrb[81].mxu0 }
 0x329   :  { %v3042_v59 = vpop.f32.mrb[82].mxu0 }
 0x32a   :  { %v1221_v48 = vpack.c.bf16 %v3042_v59, %v3041_v63  ;;  %v1194_v36 = vpop.f32.mrb[83].mxu0 }
 0x32b   :  { %v1220_v45 = vpack.c.bf16 %v1194_v36, %v1191_v1 }
 0x32d   :  { %2735 = vmatprep.subr.bf16.mxu0 %v1220_v45 }
 0x32e   :  { %2736 = vmatpush3.bf16.msra.mxu0 %v1212_v47 }
 0x32f   :  { %2737 = vmatprep.subr.bf16.mxu0 %v1221_v48  ;;  %v2414_v48 = vunpack.c.l.bf16 %v2545_v3 }
 0x332   :  { %2738 = vmatpush3.bf16.msra.mxu0 %v1213_v50 }
 0x335   :  { %1262 = vmatmul.mubr.bf16.vlgmr.msra.gmra.mrb[84].mxu0 %v3354_v4  ;;  %v3835_v4 = vld [vmem:[%s4407_s0 + $0x54] ss:$8 sps:$4 sm:$0xff]  }
 0x336   :  { %1269 = vmatprep.mubr.bf16.mxu0 %v3364_v6  ;;  %v3170_v6 = vld [vmem:[%s4412_s8 + $0x8] sm:$0xff]  }
 0x33d   :  { %1270 = vmatmul.mubr.bf16.gmra.mrb[88].mxu0 %v3378_v8  ;;  %v3172_v8 = vld [vmem:[%s4412_s8 + $0x18] sm:$0xff]  }
 0x33e   :  { %1277 = vmatprep.mubr.bf16.mxu0 %v3388_v10 }
 0x345   :  { %1278 = vmatmul.mubr.bf16.gmra.mrb[92].mxu0 %v3402_v12  ;;  %v3877_v12 = vld [vmem:[%s4414_s6] ss:$0 sm:$0xff] }
 0x346   :  { %1285 = vmatprep.mubr.bf16.mxu0 %v3412_v14 }
 0x34d   :  { %1286 = vmatmul.mubr.bf16.gmra.mrb[96].mxu0 %v3426_v16 }
 0x34e   :  { %1293 = vmatprep.mubr.bf16.mxu0 %v3436_v18 }
 0x355   :  { %1294 = vmatmul.mubr.bf16.gmra.mrb[100].mxu0 %v3450_v20 }
 0x356   :  { %1301 = vmatprep.mubr.bf16.mxu0 %v3835_v4 }
 0x35d   :  { %1302 = vmatmul.mubr.bf16.gmra.mrb[104].mxu0 %v3359_v5  ;;  %v3169_v5 = vld [vmem:[%s4412_s8] sm:$0xff]  }
 0x35e   :  { %1309 = vmatprep.mubr.bf16.mxu0 %v3369_v7  ;;  %3043 = vmatprep.subr.bf16.mxu1 %v3169_v5  ;;  %v3171_v7 = vld [vmem:[%s4412_s8 + $0x10] sm:$0xff]  }
 0x35f   :  { %3044 = vmatpush3.bf16.msra.mxu1 %v3169_v5 }
 0x360   :  { %3045 = vmatprep.subr.bf16.mxu1 %v3170_v6 }
 0x363   :  { %3046 = vmatpush3.bf16.msra.mxu1 %v3170_v6 }
 0x364   :  { %3047 = vmatprep.subr.bf16.mxu1 %v3171_v7 }
 0x365   :  { %1310 = vmatmul.mubr.bf16.gmra.mrb[108].mxu0 %v3383_v9  ;;  %v2401_v9 = vld [vmem:[%s4413_s7] sm:$0xff]  }
 0x366   :  { %1317 = vmatprep.mubr.bf16.mxu0 %v3393_v11  ;;  %v2402_v11 = vunpack.c.l.bf16 %v2401_v9  ;;  %v2403_v16 = vunpack.c.h.bf16 %v2401_v9 }
 0x367   :  { %3048 = vmatpush3.bf16.msra.mxu1 %v3171_v7  ;;  %v2415_v7 = vunpack.c.h.bf16 %v2545_v3 }
 0x368   :  { %3049 = vmatprep.subr.bf16.mxu1 %v3172_v8 }
 0x36b   :  { %3050 = vmatpush3.bf16.msra.mxu1 %v3172_v8 }
 0x36d   :  { %1318 = vmatmul.mubr.bf16.gmra.mrb[112].mxu0 %v3407_v13 }
 0x36e   :  { %1325 = vmatprep.mubr.bf16.mxu0 %v3417_v15 }
 0x375   :  { %1326 = vmatmul.mubr.bf16.gmra.mrb[116].mxu0 %v3431_v17 }
 0x376   :  { %1333 = vmatprep.mubr.bf16.mxu0 %v3441_v19  ;;  %v1486_v19 = vmul.f32 1.4285715, %v2402_v11  ;;  %v1492_v11 = vmul.f32 1.4285715, %v2414_v48 }
 0x37d   :  { %1334 = vmatmul.mubr.bf16.gmra.mrb[120].mxu0 %v3455_v21  ;;  %v2543_v21 = vld [vmem:[%s4413_s7 + $0x8] sm:$0xff]  }
 0x37e   :  { %1341 = vmatprep.mubr.bf16.mxu0 %v3460_v22 }
 0x385   :  { %1342 = vmatmul.mubr.bf16.gmra.mrb[124].mxu0 %v3468_v23 }
 0x386   :  { %1349 = vmatprep.mubr.bf16.mxu0 %v3473_v24  ;;  %v1487_v24 = vmul.f32 1.4285715, %v2403_v16 }
 0x38d   :  { %1350 = vmatmul.mubr.bf16.gmra.mrb[128].mxu0 %v3480_v25 }
 0x38e   :  { %1357 = vmatprep.mubr.bf16.mxu0 %v3485_v26 }
 0x395   :  { %1358 = vmatmul.mubr.bf16.gmra.mrb[132].mxu0 %v3492_v27 }
 0x396   :  { %1365 = vmatprep.mubr.bf16.mxu0 %v3497_v28  ;;  %v2406_v28 = vunpack.c.l.bf16 %v2543_v21 }
 0x398   :  { %v1488_v42 = vmul.f32 1.4285715, %v2406_v28 }
 0x39d   :  { %1366 = vmatmul.mubr.bf16.gmra.mrb[136].mxu0 %v3504_v29 }
 0x39e   :  { %1373 = vmatprep.mubr.bf16.mxu0 %v3509_v30 }
 0x3a5   :  { %1374 = vmatmul.mubr.bf16.gmra.mrb[140].mxu0 %v3516_v31 }
 0x3a6   :  { %1381 = vmatprep.mubr.bf16.mxu0 %v3521_v32 }
 0x3ad   :  { %1382 = vmatmul.mubr.bf16.gmra.mrb[144].mxu0 %v3528_v33  ;;  %v2407_v33 = vunpack.c.h.bf16 %v2543_v21 }
 0x3af   :  { %v1489_v47 = vmul.f32 1.4285715, %v2407_v33 }
 0x408   :  { %v2739_v10 = vpop.f32.mrb[84].mxu0 }
 0x409   :  { %v2740_v13 = vpop.f32.mrb[85].mxu0 }
 0x40a   :  { %v2741_v14 = vadd.f32 %v2740_v13, %v2739_v10  ;;  %v2742_v15 = vpop.f32.mrb[86].mxu0 }
 0x40b   :  { %v2743_v17 = vpop.f32.mrb[87].mxu0 }
 0x40c   :  { %v1264_v18 = vadd.f32 %v2741_v14, %v3877_v12  ;;  %v2744_v20 = vadd.f32 %v2743_v17, %v2742_v15  ;;  %v2546_v14 = vld [vmem:[%s4413_s7 + $0x20] sm:$0xff]   ;;  %v1493_v17 = vmul.f32 1.4285715, %v2415_v7 }
 0x40d   :  { %v2418_v21 = vunpack.c.l.bf16 %v2546_v14 }
 0x40e   :  { %v1390_v22 = vmax.f32 %v1264_v18, 0.0  ;;  %v1267_v23 = vadd.f32 %v2744_v20, %v3877_v12 }
 0x410   :  { %v1518_v25 = vmul.f32 %v1486_v19, %v1390_v22  ;;  %v1391_v26 = vmax.f32 %v1267_v23, 0.0  ;;  %v2745_v27 = vpop.f32.mrb[88].mxu0 }
 0x411   :  { %v2746_v29 = vpop.f32.mrb[89].mxu0 }
 0x412   :  { %1550 = vst.msk [vmem:[%s4415_s12] sm:$0xff] %vm916_vm1, %v1518_v25  ;;  %v1519_v30 = vmul.f32 %v1487_v24, %v1391_v26  ;;  %v2747_v31 = vadd.f32 %v2746_v29, %v2745_v27  ;;  %v2748_v32 = vpop.f32.mrb[90].mxu0  ;;  %v2419_v26 = vunpack.c.h.bf16 %v2546_v14 }
 0x413   :  { %v2749_v62 = vpop.f32.mrb[91].mxu0 }
 0x414   :  { %1551 = vst.msk [vmem:[%s4415_s12 + $0x8] sm:$0xff] %vm916_vm1, %v1519_v30  ;;  %v1582_v39 = vpack.c.bf16 %v1519_v30, %v1518_v25  ;;  %v1272_v38 = vadd.f32 %v2747_v31, %v3877_v12  ;;  %v2750_v0 = vadd.f32 %v2749_v62, %v2748_v32  ;;  %v1494_v30 = vmul.f32 1.4285715, %v2418_v21  ;;  %v2547_v32 = vld [vmem:[%s4413_s7 + $0x28] sm:$0xff]  }
 0x415   :  { %v2422_v46 = vunpack.c.l.bf16 %v2547_v32 }
 0x416   :  { %v1392_v50 = vmax.f32 %v1272_v38, 0.0  ;;  %v1275_v52 = vadd.f32 %v2750_v0, %v3877_v12  ;;  %3051 = vmatprep.mubr.msk.bf16.mxu1 %vm916_vm1, %v1582_v39  ;;  %v1495_v39 = vmul.f32 1.4285715, %v2419_v26 }
 0x418   :  { %v1520_v58 = vmul.f32 %v1488_v42, %v1392_v50  ;;  %v1393_v43 = vmax.f32 %v1275_v52, 0.0  ;;  %v2751_v35 = vpop.f32.mrb[92].mxu0 }
 0x419   :  { %v2752_v49 = vpop.f32.mrb[93].mxu0 }
 0x41a   :  { %1552 = vst.msk [vmem:[%s4415_s12 + $0x10] sm:$0xff] %vm916_vm1, %v1520_v58  ;;  %v1521_v57 = vmul.f32 %v1489_v47, %v1393_v43  ;;  %v2753_v55 = vadd.f32 %v2752_v49, %v2751_v35  ;;  %v2754_v60 = vpop.f32.mrb[94].mxu0  ;;  %v2423_v43 = vunpack.c.h.bf16 %v2547_v32 }
 0x41b   :  { %v2755_v54 = vpop.f32.mrb[95].mxu0 }
 0x41c   :  { %1553 = vst.msk [vmem:[%s4415_s12 + $0x18] sm:$0xff] %vm916_vm1, %v1521_v57  ;;  %v1583_v37 = vpack.c.bf16 %v1521_v57, %v1520_v58  ;;  %v1280_v61 = vadd.f32 %v2753_v55, %v3877_v12  ;;  %v2756_v40 = vadd.f32 %v2755_v54, %v2754_v60  ;;  %v1496_v57 = vmul.f32 1.4285715, %v2422_v46  ;;  %v2548_v60 = vld [vmem:[%s4413_s7 + $0x30] sm:$0xff]  }
 0x41d   :  { %v2426_v3 = vunpack.c.l.bf16 %v2548_v60 }
 0x41e   :  { %v1394_v34 = vmax.f32 %v1280_v61, 0.0  ;;  %v1283_v41 = vadd.f32 %v2756_v40, %v3877_v12  ;;  %3052 = vmatmul.mubr.msk.bf16.vlgmr.msra.gmra.mrb[44].mxu1 %vm916_vm1, %v1583_v37  ;;  %v1497_v37 = vmul.f32 1.4285715, %v2423_v43 }
 0x420   :  { %v1522_v63 = vmul.f32 %v1490_v53, %v1394_v34  ;;  %v1395_v1 = vmax.f32 %v1283_v41, 0.0  ;;  %v2757_v59 = vpop.f32.mrb[96].mxu0 }
 0x421   :  { %v2758_v36 = vpop.f32.mrb[97].mxu0 }
 0x422   :  { %1554 = vst.msk [vmem:[%s4415_s12 + $0x20] sm:$0xff] %vm916_vm1, %v1522_v63  ;;  %v1523_v45 = vmul.f32 %v1491_v51, %v1395_v1  ;;  %v2759_v5 = vadd.f32 %v2758_v36, %v2757_v59  ;;  %v2760_v6 = vpop.f32.mrb[98].mxu0  ;;  %v2427_v1 = vunpack.c.h.bf16 %v2548_v60 }
 0x423   :  { %v2761_v8 = vpop.f32.mrb[99].mxu0 }
 0x424   :  { %1555 = vst.msk [vmem:[%s4415_s12 + $0x28] sm:$0xff] %vm916_vm1, %v1523_v45  ;;  %v1584_v9 = vpack.c.bf16 %v1523_v45, %v1522_v63  ;;  %v1288_v10 = vadd.f32 %v2759_v5, %v3877_v12  ;;  %v2762_v13 = vadd.f32 %v2761_v8, %v2760_v6  ;;  %v1498_v45 = vmul.f32 1.4285715, %v2426_v3  ;;  %v2549_v6 = vld [vmem:[%s4413_s7 + $0x38] sm:$0xff]  }
 0x425   :  { %v2430_v14 = vunpack.c.l.bf16 %v2549_v6 }
 0x426   :  { %v1396_v15 = vmax.f32 %v1288_v10, 0.0  ;;  %v1291_v16 = vadd.f32 %v2762_v13, %v3877_v12  ;;  %3055 = vmatprep.mubr.msk.bf16.mxu1 %vm916_vm1, %v1584_v9  ;;  %v1499_v9 = vmul.f32 1.4285715, %v2427_v1 }
 0x428   :  { %v1524_v18 = vmul.f32 %v1492_v11, %v1396_v15  ;;  %v1397_v19 = vmax.f32 %v1291_v16, 0.0  ;;  %v2763_v20 = vpop.f32.mrb[100].mxu0 }
 0x429   :  { %v2764_v22 = vpop.f32.mrb[101].mxu0 }
 0x42a   :  { %1556 = vst.msk [vmem:[%s4415_s12 + $0x30] sm:$0xff] %vm916_vm1, %v1524_v18  ;;  %v1525_v23 = vmul.f32 %v1493_v17, %v1397_v19  ;;  %v2765_v24 = vadd.f32 %v2764_v22, %v2763_v20  ;;  %v2766_v25 = vpop.f32.mrb[102].mxu0  ;;  %v2431_v19 = vunpack.c.h.bf16 %v2549_v6 }
 0x42b   :  { %v2767_v27 = vpop.f32.mrb[103].mxu0 }
 0x42c   :  { %1557 = vst.msk [vmem:[%s4415_s12 + $0x38] sm:$0xff] %vm916_vm1, %v1525_v23  ;;  %v1585_v28 = vpack.c.bf16 %v1525_v23, %v1524_v18  ;;  %v1296_v29 = vadd.f32 %v2765_v24, %v3877_v12  ;;  %v2768_v31 = vadd.f32 %v2767_v27, %v2766_v25  ;;  %v1500_v23 = vmul.f32 1.4285715, %v2430_v14  ;;  %v2550_v25 = vld [vmem:[%s4413_s7 + $0x40] sm:$0xff]  }
 0x42d   :  { %v2434_v32 = vunpack.c.l.bf16 %v2550_v25 }
 0x42e   :  { %v1398_v33 = vmax.f32 %v1296_v29, 0.0  ;;  %v1299_v62 = vadd.f32 %v2768_v31, %v3877_v12  ;;  %3056 = vmatmul.mubr.msk.bf16.gmra.mrb[48].mxu1 %vm916_vm1, %v1585_v28  ;;  %v1501_v28 = vmul.f32 1.4285715, %v2431_v19 }
 0x430   :  { %v1526_v38 = vmul.f32 %v1494_v30, %v1398_v33  ;;  %v1399_v42 = vmax.f32 %v1299_v62, 0.0  ;;  %v2769_v0 = vpop.f32.mrb[104].mxu0 }
 0x431   :  { %v2770_v50 = vpop.f32.mrb[105].mxu0 }
 0x432   :  { %1558 = vst.msk [vmem:[%s4415_s12 + $0x40] sm:$0xff] %vm916_vm1, %v1526_v38  ;;  %v1527_v52 = vmul.f32 %v1495_v39, %v1399_v42  ;;  %v2771_v47 = vadd.f32 %v2770_v50, %v2769_v0  ;;  %v2772_v58 = vpop.f32.mrb[106].mxu0  ;;  %v2435_v42 = vunpack.c.h.bf16 %v2550_v25 }
 0x433   :  { %v2773_v35 = vpop.f32.mrb[107].mxu0 }
 0x434   :  { %1559 = vst.msk [vmem:[%s4415_s12 + $0x48] sm:$0xff] %vm916_vm1, %v1527_v52  ;;  %v1586_v56 = vpack.c.bf16 %v1527_v52, %v1526_v38  ;;  %v1304_v49 = vadd.f32 %v2771_v47, %v3877_v12  ;;  %v2774_v55 = vadd.f32 %v2773_v35, %v2772_v58  ;;  %v1502_v52 = vmul.f32 1.4285715, %v2434_v32  ;;  %v2551_v58 = vld [vmem:[%s4413_s7 + $0x48] sm:$0xff]  }
 0x435   :  { %v2438_v60 = vunpack.c.l.bf16 %v2551_v58 }
 0x436   :  { %v1400_v2 = vmax.f32 %v1304_v49, 0.0  ;;  %v1307_v54 = vadd.f32 %v2774_v55, %v3877_v12  ;;  %3059 = vmatprep.mubr.msk.bf16.mxu1 %vm916_vm1, %v1586_v56  ;;  %v1503_v56 = vmul.f32 1.4285715, %v2435_v42 }
 0x438   :  { %v1528_v61 = vmul.f32 %v1496_v57, %v1400_v2  ;;  %v1401_v53 = vmax.f32 %v1307_v54, 0.0  ;;  %v2775_v40 = vpop.f32.mrb[108].mxu0 }
 0x439   :  { %v2776_v34 = vpop.f32.mrb[109].mxu0 }
 0x43a   :  { %1560 = vst.msk [vmem:[%s4415_s12 + $0x50] sm:$0xff] %vm916_vm1, %v1528_v61  ;;  %v1529_v41 = vmul.f32 %v1497_v37, %v1401_v53  ;;  %v2777_v51 = vadd.f32 %v2776_v34, %v2775_v40  ;;  %v2778_v63 = vpop.f32.mrb[110].mxu0  ;;  %v2439_v53 = vunpack.c.h.bf16 %v2551_v58 }
 0x43b   :  { %v2779_v59 = vpop.f32.mrb[111].mxu0 }
 0x43c   :  { %1561 = vst.msk [vmem:[%s4415_s12 + $0x58] sm:$0xff] %vm916_vm1, %v1529_v41  ;;  %v1587_v48 = vpack.c.bf16 %v1529_v41, %v1528_v61  ;;  %v1312_v36 = vadd.f32 %v2777_v51, %v3877_v12  ;;  %v2780_v5 = vadd.f32 %v2779_v59, %v2778_v63  ;;  %v1504_v41 = vmul.f32 1.4285715, %v2438_v60  ;;  %v2552_v63 = vld [vmem:[%s4413_s7 + $0x50] sm:$0xff]  }
 0x43d   :  { %v2442_v6 = vunpack.c.l.bf16 %v2552_v63 }
 0x43e   :  { %v1402_v7 = vmax.f32 %v1312_v36, 0.0  ;;  %v1315_v8 = vadd.f32 %v2780_v5, %v3877_v12  ;;  %3060 = vmatmul.mubr.msk.bf16.gmra.mrb[52].mxu1 %vm916_vm1, %v1587_v48  ;;  %v1505_v48 = vmul.f32 1.4285715, %v2439_v53 }
 0x440   :  { %v1530_v10 = vmul.f32 %v1498_v45, %v1402_v7  ;;  %v1403_v11 = vmax.f32 %v1315_v8, 0.0  ;;  %v2781_v13 = vpop.f32.mrb[112].mxu0 }
 0x441   :  { %v2782_v15 = vpop.f32.mrb[113].mxu0 }
 0x442   :  { %1562 = vst.msk [vmem:[%s4415_s12 + $0x60] sm:$0xff] %vm916_vm1, %v1530_v10  ;;  %v1531_v16 = vmul.f32 %v1499_v9, %v1403_v11  ;;  %v2783_v17 = vadd.f32 %v2782_v15, %v2781_v13  ;;  %v2784_v18 = vpop.f32.mrb[114].mxu0  ;;  %v2443_v11 = vunpack.c.h.bf16 %v2552_v63 }
 0x443   :  { %v2785_v20 = vpop.f32.mrb[115].mxu0 }
 0x444   :  { %1563 = vst.msk [vmem:[%s4415_s12 + $0x68] sm:$0xff] %vm916_vm1, %v1531_v16  ;;  %v1588_v21 = vpack.c.bf16 %v1531_v16, %v1530_v10  ;;  %v1320_v22 = vadd.f32 %v2783_v17, %v3877_v12  ;;  %v2786_v24 = vadd.f32 %v2785_v20, %v2784_v18  ;;  %v1506_v16 = vmul.f32 1.4285715, %v2442_v6  ;;  %v2553_v18 = vld [vmem:[%s4413_s7 + $0x58] sm:$0xff]  }
 0x445   :  { %v2446_v25 = vunpack.c.l.bf16 %v2553_v18 }
 0x446   :  { %v1404_v26 = vmax.f32 %v1320_v22, 0.0  ;;  %v1323_v27 = vadd.f32 %v2786_v24, %v3877_v12  ;;  %3063 = vmatprep.mubr.msk.bf16.mxu1 %vm916_vm1, %v1588_v21  ;;  %v1507_v21 = vmul.f32 1.4285715, %v2443_v11 }
 0x448   :  { %v1532_v29 = vmul.f32 %v1500_v23, %v1404_v26  ;;  %v1405_v30 = vmax.f32 %v1323_v27, 0.0  ;;  %v2787_v31 = vpop.f32.mrb[116].mxu0 }
 0x449   :  { %v2788_v33 = vpop.f32.mrb[117].mxu0 }
 0x44a   :  { %1564 = vst.msk [vmem:[%s4415_s12 + $0x70] sm:$0xff] %vm916_vm1, %v1532_v29  ;;  %v1533_v62 = vmul.f32 %v1501_v28, %v1405_v30  ;;  %v2789_v39 = vadd.f32 %v2788_v33, %v2787_v31  ;;  %v2790_v38 = vpop.f32.mrb[118].mxu0  ;;  %v2447_v30 = vunpack.c.h.bf16 %v2553_v18 }
 0x44b   :  { %v2791_v0 = vpop.f32.mrb[119].mxu0 }
 0x44c   :  { %1565 = vst.msk [vmem:[%s4415_s12 + $0x78] sm:$0xff] %vm916_vm1, %v1533_v62  ;;  %v1589_v46 = vpack.c.bf16 %v1533_v62, %v1532_v29  ;;  %v1328_v50 = vadd.f32 %v2789_v39, %v3877_v12  ;;  %v2792_v47 = vadd.f32 %v2791_v0, %v2790_v38  ;;  %v1508_v62 = vmul.f32 1.4285715, %v2446_v25  ;;  %v2554_v38 = vld [vmem:[%s4413_s7 + $0x60] sm:$0xff]  }
 0x44d   :  { %v2450_v58 = vunpack.c.l.bf16 %v2554_v38 }
 0x44e   :  { %v1406_v43 = vmax.f32 %v1328_v50, 0.0  ;;  %v1331_v35 = vadd.f32 %v2792_v47, %v3877_v12  ;;  %3064 = vmatmul.mubr.msk.bf16.gmra.mrb[56].mxu1 %vm916_vm1, %v1589_v46  ;;  %v1509_v46 = vmul.f32 1.4285715, %v2447_v30 }
 0x450   :  { %v1534_v49 = vmul.f32 %v1502_v52, %v1406_v43  ;;  %v1407_v57 = vmax.f32 %v1331_v35, 0.0  ;;  %v2793_v55 = vpop.f32.mrb[120].mxu0 }
 0x451   :  { %v2794_v2 = vpop.f32.mrb[121].mxu0 }
 0x452   :  { %1566 = vst.msk [vmem:[%s4415_s12 + $0x80] sm:$0xff] %vm916_vm1, %v1534_v49  ;;  %v1535_v54 = vmul.f32 %v1503_v56, %v1407_v57  ;;  %v2795_v37 = vadd.f32 %v2794_v2, %v2793_v55  ;;  %v2796_v61 = vpop.f32.mrb[122].mxu0  ;;  %v2451_v57 = vunpack.c.h.bf16 %v2554_v38 }
 0x453   :  { %v2797_v40 = vpop.f32.mrb[123].mxu0 }
 0x454   :  { %1567 = vst.msk [vmem:[%s4415_s12 + $0x88] sm:$0xff] %vm916_vm1, %v1535_v54  ;;  %v1590_v3 = vpack.c.bf16 %v1535_v54, %v1534_v49  ;;  %v1336_v34 = vadd.f32 %v2795_v37, %v3877_v12  ;;  %v2798_v51 = vadd.f32 %v2797_v40, %v2796_v61  ;;  %v1510_v54 = vmul.f32 1.4285715, %v2450_v58  ;;  %v2555_v61 = vld [vmem:[%s4413_s7 + $0x68] sm:$0xff]  }
 0x455   :  { %v2454_v63 = vunpack.c.l.bf16 %v2555_v61 }
 0x456   :  { %v1408_v1 = vmax.f32 %v1336_v34, 0.0  ;;  %v1339_v59 = vadd.f32 %v2798_v51, %v3877_v12  ;;  %3067 = vmatprep.mubr.msk.bf16.mxu1 %vm916_vm1, %v1590_v3  ;;  %v1511_v3 = vmul.f32 1.4285715, %v2451_v57 }
 0x458   :  { %v1536_v36 = vmul.f32 %v1504_v41, %v1408_v1  ;;  %v1409_v45 = vmax.f32 %v1339_v59, 0.0  ;;  %v2799_v5 = vpop.f32.mrb[124].mxu0 }
 0x459   :  { %v2800_v7 = vpop.f32.mrb[125].mxu0 }
 0x45a   :  { %1568 = vst.msk [vmem:[%s4415_s12 + $0x90] sm:$0xff] %vm916_vm1, %v1536_v36  ;;  %v1537_v8 = vmul.f32 %v1505_v48, %v1409_v45  ;;  %v2801_v9 = vadd.f32 %v2800_v7, %v2799_v5  ;;  %v2802_v10 = vpop.f32.mrb[126].mxu0  ;;  %v2455_v45 = vunpack.c.h.bf16 %v2555_v61 }
 0x45b   :  { %v2803_v13 = vpop.f32.mrb[127].mxu0 }
 0x45c   :  { %1569 = vst.msk [vmem:[%s4415_s12 + $0x98] sm:$0xff] %vm916_vm1, %v1537_v8  ;;  %v1591_v14 = vpack.c.bf16 %v1537_v8, %v1536_v36  ;;  %v1344_v15 = vadd.f32 %v2801_v9, %v3877_v12  ;;  %v2804_v17 = vadd.f32 %v2803_v13, %v2802_v10  ;;  %v1512_v8 = vmul.f32 1.4285715, %v2454_v63  ;;  %v2556_v10 = vld [vmem:[%s4413_s7 + $0x70] sm:$0xff]  }
 0x45d   :  { %v2458_v18 = vunpack.c.l.bf16 %v2556_v10 }
 0x45e   :  { %v1410_v19 = vmax.f32 %v1344_v15, 0.0  ;;  %3068 = vmatmul.mubr.msk.bf16.gmra.mrb[60].mxu1 %vm916_vm1, %v1591_v14  ;;  %v1347_v20 = vadd.f32 %v2804_v17, %v3877_v12  ;;  %v1513_v14 = vmul.f32 1.4285715, %v2455_v45 }
 0x460   :  { %v1538_v22 = vmul.f32 %v1506_v16, %v1410_v19  ;;  %v1411_v23 = vmax.f32 %v1347_v20, 0.0  ;;  %v2805_v24 = vpop.f32.mrb[128].mxu0 }
 0x461   :  { %v2806_v26 = vpop.f32.mrb[129].mxu0 }
 0x462   :  { %1570 = vst.msk [vmem:[%s4415_s12 + $0xa0] sm:$0xff] %vm916_vm1, %v1538_v22  ;;  %v1539_v27 = vmul.f32 %v1507_v21, %v1411_v23  ;;  %v2807_v28 = vadd.f32 %v2806_v26, %v2805_v24  ;;  %v2808_v29 = vpop.f32.mrb[130].mxu0  ;;  %v2459_v23 = vunpack.c.h.bf16 %v2556_v10 }
 0x463   :  { %v2809_v31 = vpop.f32.mrb[131].mxu0 }
 0x464   :  { %1571 = vst.msk [vmem:[%s4415_s12 + $0xa8] sm:$0xff] %vm916_vm1, %v1539_v27  ;;  %v1592_v32 = vpack.c.bf16 %v1539_v27, %v1538_v22  ;;  %v1352_v33 = vadd.f32 %v2807_v28, %v3877_v12  ;;  %v2810_v39 = vadd.f32 %v2809_v31, %v2808_v29  ;;  %v1514_v27 = vmul.f32 1.4285715, %v2458_v18  ;;  %v2557_v29 = vld [vmem:[%s4413_s7 + $0x78] sm:$0xff]  }
 0x465   :  { %v2462_v38 = vunpack.c.l.bf16 %v2557_v29 }
 0x466   :  { %v1412_v42 = vmax.f32 %v1352_v33, 0.0  ;;  %v1355_v0 = vadd.f32 %v2810_v39, %v3877_v12  ;;  %3071 = vmatprep.mubr.msk.bf16.mxu1 %vm916_vm1, %v1592_v32  ;;  %v1515_v32 = vmul.f32 1.4285715, %v2459_v23 }
 0x468   :  { %v1540_v50 = vmul.f32 %v1508_v62, %v1412_v42  ;;  %v1413_v52 = vmax.f32 %v1355_v0, 0.0  ;;  %v2811_v47 = vpop.f32.mrb[132].mxu0 }
 0x469   :  { %v2812_v43 = vpop.f32.mrb[133].mxu0 }
 0x46a   :  { %1572 = vst.msk [vmem:[%s4415_s12 + $0xb0] sm:$0xff] %vm916_vm1, %v1540_v50  ;;  %v1541_v35 = vmul.f32 %v1509_v46, %v1413_v52  ;;  %v2813_v56 = vadd.f32 %v2812_v43, %v2811_v47  ;;  %v2814_v49 = vpop.f32.mrb[134].mxu0  ;;  %v2463_v52 = vunpack.c.h.bf16 %v2557_v29 }
 0x46b   :  { %v2815_v55 = vpop.f32.mrb[135].mxu0 }
 0x46c   :  { %1573 = vst.msk [vmem:[%s4415_s12 + $0xb8] sm:$0xff] %vm916_vm1, %v1541_v35  ;;  %v1593_v60 = vpack.c.bf16 %v1541_v35, %v1540_v50  ;;  %v1360_v2 = vadd.f32 %v2813_v56, %v3877_v12  ;;  %v2816_v37 = vadd.f32 %v2815_v55, %v2814_v49  ;;  %v1516_v35 = vmul.f32 1.4285715, %v2462_v38 }
 0x46d   :  { %v1517_v55 = vmul.f32 1.4285715, %v2463_v52  ;;  %v3177_v52 = vld [vmem:[%s4407_s0 + $0x10] ss:$8 sps:$4 sm:$0xff]  }
 0x46e   :  { %v1414_v53 = vmax.f32 %v1360_v2, 0.0  ;;  %3072 = vmatmul.mubr.msk.bf16.gmra.mrb[64].mxu1 %vm916_vm1, %v1593_v60  ;;  %v1363_v40 = vadd.f32 %v2816_v37, %v3877_v12 }
 0x470   :  { %v1542_v34 = vmul.f32 %v1510_v54, %v1414_v53  ;;  %v1415_v41 = vmax.f32 %v1363_v40, 0.0  ;;  %v2817_v51 = vpop.f32.mrb[136].mxu0 }
 0x471   :  { %v2818_v1 = vpop.f32.mrb[137].mxu0 }
 0x472   :  { %1574 = vst.msk [vmem:[%s4415_s12 + $0xc0] sm:$0xff] %vm916_vm1, %v1542_v34  ;;  %v1543_v59 = vmul.f32 %v1511_v3, %v1415_v41  ;;  %v2819_v48 = vadd.f32 %v2818_v1, %v2817_v51  ;;  %v2820_v36 = vpop.f32.mrb[138].mxu0 }
 0x473   :  { %v2821_v5 = vpop.f32.mrb[139].mxu0 }
 0x474   :  { %1575 = vst.msk [vmem:[%s4415_s12 + $0xc8] sm:$0xff] %vm916_vm1, %v1543_v59  ;;  %v1594_v6 = vpack.c.bf16 %v1543_v59, %v1542_v34  ;;  %v1368_v7 = vadd.f32 %v2819_v48, %v3877_v12  ;;  %v2822_v9 = vadd.f32 %v2821_v5, %v2820_v36 }
 0x476   :  { %v1416_v11 = vmax.f32 %v1368_v7, 0.0  ;;  %v1371_v13 = vadd.f32 %v2822_v9, %v3877_v12  ;;  %3075 = vmatprep.mubr.msk.bf16.mxu1 %vm916_vm1, %v1594_v6 }
 0x478   :  { %v1544_v15 = vmul.f32 %v1512_v8, %v1416_v11  ;;  %v1417_v16 = vmax.f32 %v1371_v13, 0.0  ;;  %v2823_v17 = vpop.f32.mrb[140].mxu0 }
 0x479   :  { %v2824_v19 = vpop.f32.mrb[141].mxu0 }
 0x47a   :  { %1576 = vst.msk [vmem:[%s4415_s12 + $0xd0] sm:$0xff] %vm916_vm1, %v1544_v15  ;;  %v1545_v20 = vmul.f32 %v1513_v14, %v1417_v16  ;;  %v2825_v21 = vadd.f32 %v2824_v19, %v2823_v17  ;;  %v2826_v22 = vpop.f32.mrb[142].mxu0 }
 0x47b   :  { %v2827_v24 = vpop.f32.mrb[143].mxu0 }
 0x47c   :  { %1577 = vst.msk [vmem:[%s4415_s12 + $0xd8] sm:$0xff] %vm916_vm1, %v1545_v20  ;;  %v1595_v25 = vpack.c.bf16 %v1545_v20, %v1544_v15  ;;  %v1376_v26 = vadd.f32 %v2825_v21, %v3877_v12  ;;  %v2828_v28 = vadd.f32 %v2827_v24, %v2826_v22 }
 0x47e   :  { %v1418_v30 = vmax.f32 %v1376_v26, 0.0  ;;  %3076 = vmatmul.mubr.msk.bf16.gmra.mrb[68].mxu1 %vm916_vm1, %v1595_v25  ;;  %v1379_v31 = vadd.f32 %v2828_v28, %v3877_v12 }
 0x480   :  { %v1546_v33 = vmul.f32 %v1514_v27, %v1418_v30  ;;  %v1419_v62 = vmax.f32 %v1379_v31, 0.0  ;;  %v2829_v39 = vpop.f32.mrb[144].mxu0 }
 0x481   :  { %v2830_v42 = vpop.f32.mrb[145].mxu0 }
 0x482   :  { %1578 = vst.msk [vmem:[%s4415_s12 + $0xe0] sm:$0xff] %vm916_vm1, %v1546_v33  ;;  %v1547_v0 = vmul.f32 %v1515_v32, %v1419_v62  ;;  %v2831_v46 = vadd.f32 %v2830_v42, %v2829_v39  ;;  %v2832_v50 = vpop.f32.mrb[146].mxu0 }
 0x483   :  { %v2833_v47 = vpop.f32.mrb[147].mxu0 }
 0x484   :  { %1579 = vst.msk [vmem:[%s4415_s12 + $0xe8] sm:$0xff] %vm916_vm1, %v1547_v0  ;;  %v1596_v58 = vpack.c.bf16 %v1547_v0, %v1546_v33  ;;  %v1384_v43 = vadd.f32 %v2831_v46, %v3877_v12  ;;  %v2834_v56 = vadd.f32 %v2833_v47, %v2832_v50  ;;  %v3175_v46 = vld [vmem:[%s4407_s0] ss:$8 sps:$4 sm:$0xff]   ;;  %v3176_v50 = vld [vmem:[%s4407_s0 + $0x14] ss:$8 sps:$4 sm:$0xff]  }
 0x485   :  { %v3178_v47 = vld [vmem:[%s4407_s0 + $0x24] ss:$8 sps:$4 sm:$0xff]  }
 0x486   :  { %v1420_v49 = vmax.f32 %v1384_v43, 0.0  ;;  %v1387_v57 = vadd.f32 %v2834_v56, %v3877_v12  ;;  %3079 = vmatprep.mubr.msk.bf16.mxu1 %vm916_vm1, %v1596_v58  ;;  %v3179_v58 = vld [vmem:[%s4407_s0 + $0x20] ss:$8 sps:$4 sm:$0xff]   ;;  %v3180_v43 = vld [vmem:[%s4407_s0 + $0x34] ss:$8 sps:$4 sm:$0xff]  }
 0x487   :  { %v3182_v56 = vld [vmem:[%s4407_s0 + $0x44] ss:$8 sps:$4 sm:$0xff]  }
 0x488   :  { %v1548_v60 = vmul.f32 %v1516_v35, %v1420_v49  ;;  %v1421_v2 = vmax.f32 %v1387_v57, 0.0  ;;  %v3181_v35 = vld [vmem:[%s4407_s0 + $0x30] ss:$8 sps:$4 sm:$0xff]   ;;  %v3183_v49 = vld [vmem:[%s4407_s0 + $0x40] ss:$8 sps:$4 sm:$0xff]  }
 0x489   :  { %v3184_v57 = vld [vmem:[%s4407_s0 + $0x50] ss:$8 sps:$4 sm:$0xff]  }
 0x48a   :  { %1580 = vst.msk [vmem:[%s4415_s12 + $0xf0] sm:$0xff] %vm916_vm1, %v1548_v60  ;;  %v1549_v54 = vmul.f32 %v1517_v55, %v1421_v2  ;;  %v3185_v55 = vld [vmem:[%s4407_s0 + $0x64] ss:$8 sps:$4 sm:$0xff]   ;;  %v3187_v2 = vld [vmem:[%s4407_s0 + $0x74] ss:$8 sps:$4 sm:$0xff]  }
 0x48c   :  { %1581 = vst.msk [vmem:[%s4415_s12 + $0xf8] sm:$0xff] %vm916_vm1, %v1549_v54  ;;  %v1597_v37 = vpack.c.bf16 %v1549_v54, %v1548_v60  ;;  %v3186_v60 = vld [vmem:[%s4407_s0 + $0x60] ss:$8 sps:$4 sm:$0xff]   ;;  %v3189_v54 = vld [vmem:[%s4407_s0 + $0x84] ss:$8 sps:$4 sm:$0xff]  }
 0x48e   :  { %3080 = vmatmul.mubr.msk.bf16.gmra.mrb[72].mxu1 %vm916_vm1, %v1597_v37  ;;  %v3190_v37 = vld [vmem:[%s4407_s0 + $0x80] ss:$8 sps:$4 sm:$0xff]  }
 0x48f   :  { %1894 = vmatprep.mubr.bf16.mxu1 %v3820_v44 }
 0x4f1   :  { %v3053_v12 = vpop.f32.mrb[44].mxu1 }
 0x4f2   :  { %v1712_v61 = vpop.f32.mrb[45].mxu1 }
 0x4f3   :  { %v3054_v53 = vpop.f32.mrb[46].mxu1 }
 0x4f4   :  { %v1840_v40 = vpack.c.bf16 %v3054_v53, %v3053_v12  ;;  %v1715_v3 = vpop.f32.mrb[47].mxu1  ;;  %v3191_v12 = vld [vmem:[%s4407_s0 + $0x94] ss:$8 sps:$4 sm:$0xff]   ;;  %v3193_v53 = vld [vmem:[%s4407_s0 + $0xa4] ss:$8 sps:$4 sm:$0xff]  }
 0x4f5   :  { %v1839_v34 = vpack.c.bf16 %v1715_v3, %v1712_v61  ;;  %v3192_v61 = vld [vmem:[%s4407_s0 + $0x90] ss:$8 sps:$4 sm:$0xff]   ;;  %v3195_v3 = vld [vmem:[%s4407_s0 + $0xb4] ss:$8 sps:$4 sm:$0xff]  }
 0x501   :  { %v3057_v41 = vpop.f32.mrb[48].mxu1 }
 0x502   :  { %v1728_v51 = vpop.f32.mrb[49].mxu1 }
 0x503   :  { %v3058_v63 = vpop.f32.mrb[50].mxu1 }
 0x504   :  { %v1842_v1 = vpack.c.bf16 %v3058_v63, %v3057_v41  ;;  %v1731_v59 = vpop.f32.mrb[51].mxu1  ;;  %v3197_v41 = vld [vmem:[%s4407_s0 + $0xc4] ss:$8 sps:$4 sm:$0xff]   ;;  %v3199_v63 = vld [vmem:[%s4407_s0 + $0xd4] ss:$8 sps:$4 sm:$0xff]  }
 0x505   :  { %v1841_v48 = vpack.c.bf16 %v1731_v59, %v1728_v51  ;;  %v3198_v51 = vld [vmem:[%s4407_s0 + $0xc0] ss:$8 sps:$4 sm:$0xff]   ;;  %v3201_v59 = vld [vmem:[%s4407_s0 + $0xe4] ss:$8 sps:$4 sm:$0xff]  }
 0x511   :  { %v3061_v36 = vpop.f32.mrb[52].mxu1 }
 0x512   :  { %v1744_v45 = vpop.f32.mrb[53].mxu1 }
 0x513   :  { %v3062_v5 = vpop.f32.mrb[54].mxu1 }
 0x514   :  { %v1844_v6 = vpack.c.bf16 %v3062_v5, %v3061_v36  ;;  %v1747_v7 = vpop.f32.mrb[55].mxu1  ;;  %v3203_v36 = vld [vmem:[%s4407_s0 + $0xf4] ss:$8 sps:$4 sm:$0xff]   ;;  %v2465_v5 = vld [vmem:[%s4416_s10] sm:$0xff]  }
 0x515   :  { %v1843_v8 = vpack.c.bf16 %v1747_v7, %v1744_v45  ;;  %v3204_v45 = vld [vmem:[%s4407_s0 + $0xf0] ss:$8 sps:$4 sm:$0xff]   ;;  %v2466_v7 = vunpack.c.l.bf16 %v2465_v5 }
 0x521   :  { %v3065_v9 = vpop.f32.mrb[56].mxu1 }
 0x522   :  { %v1760_v44 = vpop.f32.mrb[57].mxu1 }
 0x523   :  { %v3066_v10 = vpop.f32.mrb[58].mxu1 }
 0x524   :  { %v1846_v11 = vpack.c.bf16 %v3066_v10, %v3065_v9  ;;  %v1763_v13 = vpop.f32.mrb[59].mxu1 }
 0x525   :  { %v1845_v14 = vpack.c.bf16 %v1763_v13, %v1760_v44 }
 0x531   :  { %v3069_v15 = vpop.f32.mrb[60].mxu1 }
 0x532   :  { %v1776_v16 = vpop.f32.mrb[61].mxu1 }
 0x533   :  { %v3070_v17 = vpop.f32.mrb[62].mxu1 }
 0x534   :  { %v1848_v18 = vpack.c.bf16 %v3070_v17, %v3069_v15  ;;  %v1779_v19 = vpop.f32.mrb[63].mxu1  ;;  %v2119_v15 = vmul.f32 1.4285715, %v2466_v7  ;;  %v2558_v17 = vld [vmem:[%s4416_s10 + $0x8] sm:$0xff]  }
 0x535   :  { %v1847_v20 = vpack.c.bf16 %v1779_v19, %v1776_v16 }
 0x537   :  { %2855 = vmatprep.subr.bf16.mxu1 %v1847_v20 }
 0x538   :  { %2856 = vmatpush3.bf16.msra.mxu1 %v1839_v34  ;;  %v3196_v34 = vld [vmem:[%s4407_s0 + $0xb0] ss:$8 sps:$4 sm:$0xff]  }
 0x539   :  { %2857 = vmatprep.subr.bf16.mxu1 %v1848_v18 }
 0x53c   :  { %2858 = vmatpush3.bf16.msra.mxu1 %v1840_v40  ;;  %v3194_v40 = vld [vmem:[%s4407_s0 + $0xa0] ss:$8 sps:$4 sm:$0xff]  }
 0x541   :  { %v3073_v21 = vpop.f32.mrb[64].mxu1 }
 0x542   :  { %v1792_v22 = vpop.f32.mrb[65].mxu1 }
 0x543   :  { %v3074_v23 = vpop.f32.mrb[66].mxu1 }
 0x544   :  { %v1850_v24 = vpack.c.bf16 %v3074_v23, %v3073_v21  ;;  %v1795_v25 = vpop.f32.mrb[67].mxu1 }
 0x545   :  { %v1849_v26 = vpack.c.bf16 %v1795_v25, %v1792_v22 }
 0x547   :  { %2859 = vmatprep.subr.bf16.mxu1 %v1849_v26 }
 0x548   :  { %2860 = vmatpush3.bf16.msra.mxu1 %v1841_v48  ;;  %v3202_v48 = vld [vmem:[%s4407_s0 + $0xe0] ss:$8 sps:$4 sm:$0xff]  }
 0x549   :  { %2861 = vmatprep.subr.bf16.mxu1 %v1850_v24  ;;  %v2470_v24 = vunpack.c.l.bf16 %v2558_v17 }
 0x54c   :  { %2862 = vmatpush3.bf16.msra.mxu1 %v1842_v1  ;;  %v3200_v1 = vld [vmem:[%s4407_s0 + $0xd0] ss:$8 sps:$4 sm:$0xff]  }
 0x551   :  { %v3077_v27 = vpop.f32.mrb[68].mxu1 }
 0x552   :  { %v1808_v28 = vpop.f32.mrb[69].mxu1 }
 0x553   :  { %v3078_v29 = vpop.f32.mrb[70].mxu1 }
 0x554   :  { %v1852_v30 = vpack.c.bf16 %v3078_v29, %v3077_v27  ;;  %v1811_v31 = vpop.f32.mrb[71].mxu1  ;;  %v2471_v29 = vunpack.c.h.bf16 %v2558_v17 }
 0x555   :  { %v1851_v32 = vpack.c.bf16 %v1811_v31, %v1808_v28 }
 0x557   :  { %2863 = vmatprep.subr.bf16.mxu1 %v1851_v32  ;;  %v2121_v32 = vmul.f32 1.4285715, %v2470_v24 }
 0x558   :  { %2864 = vmatpush3.bf16.msra.mxu1 %v1843_v8  ;;  %v4198_v8 = vld [vmem:[%s4417_s9] ss:$0 sm:$0xff] }
 0x559   :  { %2865 = vmatprep.subr.bf16.mxu1 %v1852_v30 }
 0x55c   :  { %2866 = vmatpush3.bf16.msra.mxu1 %v1844_v6 }
 0x561   :  { %v3081_v33 = vpop.f32.mrb[72].mxu1 }
 0x562   :  { %v1824_v62 = vpop.f32.mrb[73].mxu1 }
 0x563   :  { %v3082_v39 = vpop.f32.mrb[74].mxu1 }
 0x564   :  { %v1854_v38 = vpack.c.bf16 %v3082_v39, %v3081_v33  ;;  %v1827_v42 = vpop.f32.mrb[75].mxu1 }
 0x565   :  { %v1853_v0 = vpack.c.bf16 %v1827_v42, %v1824_v62  ;;  %v2559_v62 = vld [vmem:[%s4416_s10 + $0x10] sm:$0xff]   ;;  %v2122_v42 = vmul.f32 1.4285715, %v2471_v29 }
 0x567   :  { %2867 = vmatprep.subr.bf16.mxu1 %v1853_v0 }
 0x568   :  { %2868 = vmatpush3.bf16.msra.mxu1 %v1845_v14 }
 0x569   :  { %2869 = vmatprep.subr.bf16.mxu1 %v1854_v38 }
 0x56c   :  { %2870 = vmatpush3.bf16.msra.mxu1 %v1846_v11  ;;  %v2467_v11 = vunpack.c.h.bf16 %v2465_v5 }
 0x56e   :  { %v2120_v20 = vmul.f32 1.4285715, %v2467_v11 }
 0x56f   :  { %1895 = vmatmul.mubr.bf16.vlgmr.msra.gmra.mrb[76].mxu1 %v3175_v46 }
 0x570   :  { %1902 = vmatprep.mubr.bf16.mxu1 %v3176_v50 }
 0x577   :  { %1903 = vmatmul.mubr.bf16.gmra.mrb[80].mxu1 %v3177_v52  ;;  %v2474_v52 = vunpack.c.l.bf16 %v2559_v62 }
 0x578   :  { %1910 = vmatprep.mubr.bf16.mxu1 %v3178_v47 }
 0x57f   :  { %1911 = vmatmul.mubr.bf16.gmra.mrb[84].mxu1 %v3179_v58 }
 0x580   :  { %1918 = vmatprep.mubr.bf16.mxu1 %v3180_v43 }
 0x587   :  { %1919 = vmatmul.mubr.bf16.gmra.mrb[88].mxu1 %v3181_v35 }
 0x588   :  { %1926 = vmatprep.mubr.bf16.mxu1 %v3182_v56  ;;  %v2475_v56 = vunpack.c.h.bf16 %v2559_v62 }
 0x58f   :  { %1927 = vmatmul.mubr.bf16.gmra.mrb[92].mxu1 %v3183_v49 }
 0x590   :  { %1934 = vmatprep.mubr.bf16.mxu1 %v3835_v4  ;;  %v3188_v4 = vld [vmem:[%s4407_s0 + $0x70] ss:$8 sps:$4 sm:$0xff]  }
 0x597   :  { %1935 = vmatmul.mubr.bf16.gmra.mrb[96].mxu1 %v3184_v57 }
 0x598   :  { %1942 = vmatprep.mubr.bf16.mxu1 %v3185_v55  ;;  %v2123_v55 = vmul.f32 1.4285715, %v2474_v52 }
 0x59f   :  { %1943 = vmatmul.mubr.bf16.gmra.mrb[100].mxu1 %v3186_v60 }
 0x5a0   :  { %1950 = vmatprep.mubr.bf16.mxu1 %v3187_v2  ;;  %v2560_v2 = vld [vmem:[%s4416_s10 + $0x18] sm:$0xff]  }
 0x5a7   :  { %1951 = vmatmul.mubr.bf16.gmra.mrb[104].mxu1 %v3188_v4 }
 0x5a8   :  { %1958 = vmatprep.mubr.bf16.mxu1 %v3189_v54 }
 0x5af   :  { %1959 = vmatmul.mubr.bf16.gmra.mrb[108].mxu1 %v3190_v37  ;;  %v2124_v37 = vmul.f32 1.4285715, %v2475_v56 }
 0x5b0   :  { %1966 = vmatprep.mubr.bf16.mxu1 %v3191_v12 }
 0x5b7   :  { %1967 = vmatmul.mubr.bf16.gmra.mrb[112].mxu1 %v3192_v61 }
 0x5b8   :  { %1974 = vmatprep.mubr.bf16.mxu1 %v3193_v53 }
 0x5bf   :  { %1975 = vmatmul.mubr.bf16.gmra.mrb[116].mxu1 %v3194_v40  ;;  %v2478_v40 = vunpack.c.l.bf16 %v2560_v2 }
 0x5c0   :  { %1982 = vmatprep.mubr.bf16.mxu1 %v3195_v3 }
 0x5c7   :  { %1983 = vmatmul.mubr.bf16.gmra.mrb[120].mxu1 %v3196_v34 }
 0x5c8   :  { %1990 = vmatprep.mubr.bf16.mxu1 %v3197_v41 }
 0x5cf   :  { %1991 = vmatmul.mubr.bf16.gmra.mrb[124].mxu1 %v3198_v51 }
 0x5d0   :  { %1998 = vmatprep.mubr.bf16.mxu1 %v3199_v63  ;;  %v2479_v63 = vunpack.c.h.bf16 %v2560_v2 }
 0x5d2   :  { %v2126_v7 = vmul.f32 1.4285715, %v2479_v63 }
 0x5d7   :  { %1999 = vmatmul.mubr.bf16.gmra.mrb[128].mxu1 %v3200_v1 }
 0x5d8   :  { %2006 = vmatprep.mubr.bf16.mxu1 %v3201_v59 }
 0x5df   :  { %2007 = vmatmul.mubr.bf16.gmra.mrb[132].mxu1 %v3202_v48  ;;  %v2125_v48 = vmul.f32 1.4285715, %v2478_v40 }
 0x5e0   :  { %2014 = vmatprep.mubr.bf16.mxu1 %v3203_v36 }
 0x5e7   :  { %2015 = vmatmul.mubr.bf16.gmra.mrb[136].mxu1 %v3204_v45  ;;  %v2561_v45 = vld [vmem:[%s4416_s10 + $0x20] sm:$0xff]  }
 0x5e8   :  { %v2482_v11 = vunpack.c.l.bf16 %v2561_v45  ;;  %v2483_v17 = vunpack.c.h.bf16 %v2561_v45 }
 0x642   :  { %v2871_v6 = vpop.f32.mrb[76].mxu1 }
 0x643   :  { %v2872_v9 = vpop.f32.mrb[77].mxu1 }
 0x644   :  { %v2873_v44 = vadd.f32 %v2872_v9, %v2871_v6  ;;  %v2874_v10 = vpop.f32.mrb[78].mxu1 }
 0x645   :  { %v2875_v13 = vpop.f32.mrb[79].mxu1 }
 0x646   :  { %v1897_v14 = vadd.f32 %v2873_v44, %v4198_v8  ;;  %v2876_v16 = vadd.f32 %v2875_v13, %v2874_v10 }
 0x648   :  { %v2023_v18 = vmax.f32 %v1897_v14, 0.0  ;;  %v1900_v19 = vadd.f32 %v2876_v16, %v4198_v8 }
 0x64a   :  { %v2151_v21 = vmul.f32 %v2119_v15, %v2023_v18  ;;  %v2024_v22 = vmax.f32 %v1900_v19, 0.0  ;;  %v2877_v23 = vpop.f32.mrb[80].mxu1 }
 0x64b   :  { %v2878_v25 = vpop.f32.mrb[81].mxu1 }
 0x64c   :  { %2183 = vst.msk [vmem:[%s4418_s13] sm:$0xff] %vm202_vm0, %v2151_v21  ;;  %v2152_v26 = vmul.f32 %v2120_v20, %v2024_v22  ;;  %v2879_v27 = vadd.f32 %v2878_v25, %v2877_v23  ;;  %v2880_v28 = vpop.f32.mrb[82].mxu1  ;;  %v2127_v20 = vmul.f32 1.4285715, %v2482_v11  ;;  %v2562_v22 = vld [vmem:[%s4416_s10 + $0x28] sm:$0xff]  }
 0x64d   :  { %v2881_v30 = vpop.f32.mrb[83].mxu1  ;;  %v2128_v25 = vmul.f32 1.4285715, %v2483_v17  ;;  %v2486_v29 = vunpack.c.l.bf16 %v2562_v22  ;;  %v2487_v62 = vunpack.c.h.bf16 %v2562_v22 }
 0x64e   :  { %2184 = vst.msk [vmem:[%s4418_s13 + $0x8] sm:$0xff] %vm202_vm0, %v2152_v26  ;;  %v1905_v31 = vadd.f32 %v2879_v27, %v4198_v8  ;;  %v2882_v33 = vadd.f32 %v2881_v30, %v2880_v28 }
 0x650   :  { %v2025_v39 = vmax.f32 %v1905_v31, 0.0  ;;  %v1908_v38 = vadd.f32 %v2882_v33, %v4198_v8 }
 0x652   :  { %v2153_v0 = vmul.f32 %v2121_v32, %v2025_v39  ;;  %v2026_v46 = vmax.f32 %v1908_v38, 0.0  ;;  %v2883_v50 = vpop.f32.mrb[84].mxu1 }
 0x653   :  { %v2884_v47 = vpop.f32.mrb[85].mxu1 }
 0x654   :  { %2185 = vst.msk [vmem:[%s4418_s13 + $0x10] sm:$0xff] %vm202_vm0, %v2153_v0  ;;  %v2154_v58 = vmul.f32 %v2122_v42, %v2026_v46  ;;  %v2885_v43 = vadd.f32 %v2884_v47, %v2883_v50  ;;  %v2886_v35 = vpop.f32.mrb[86].mxu1  ;;  %v2129_v42 = vmul.f32 1.4285715, %v2486_v29  ;;  %v2563_v46 = vld [vmem:[%s4416_s10 + $0x30] sm:$0xff]  }
 0x655   :  { %v2887_v49 = vpop.f32.mrb[87].mxu1  ;;  %v2130_v47 = vmul.f32 1.4285715, %v2487_v62  ;;  %v2490_v56 = vunpack.c.l.bf16 %v2563_v46  ;;  %v2491_v2 = vunpack.c.h.bf16 %v2563_v46 }
 0x656   :  { %2186 = vst.msk [vmem:[%s4418_s13 + $0x18] sm:$0xff] %vm202_vm0, %v2154_v58  ;;  %v1913_v57 = vadd.f32 %v2885_v43, %v4198_v8  ;;  %v2888_v60 = vadd.f32 %v2887_v49, %v2886_v35 }
 0x658   :  { %v2027_v4 = vmax.f32 %v1913_v57, 0.0  ;;  %v1916_v54 = vadd.f32 %v2888_v60, %v4198_v8 }
 0x65a   :  { %v2155_v12 = vmul.f32 %v2123_v55, %v2027_v4  ;;  %v2028_v61 = vmax.f32 %v1916_v54, 0.0  ;;  %v2889_v53 = vpop.f32.mrb[88].mxu1 }
 0x65b   :  { %v2890_v3 = vpop.f32.mrb[89].mxu1 }
 0x65c   :  { %2187 = vst.msk [vmem:[%s4418_s13 + $0x20] sm:$0xff] %vm202_vm0, %v2155_v12  ;;  %v2156_v34 = vmul.f32 %v2124_v37, %v2028_v61  ;;  %v2891_v41 = vadd.f32 %v2890_v3, %v2889_v53  ;;  %v2892_v51 = vpop.f32.mrb[90].mxu1  ;;  %v2131_v37 = vmul.f32 1.4285715, %v2490_v56  ;;  %v2564_v61 = vld [vmem:[%s4416_s10 + $0x38] sm:$0xff]  }
 0x65d   :  { %v2893_v1 = vpop.f32.mrb[91].mxu1  ;;  %v2132_v3 = vmul.f32 1.4285715, %v2491_v2  ;;  %v2494_v63 = vunpack.c.l.bf16 %v2564_v61  ;;  %v2495_v45 = vunpack.c.h.bf16 %v2564_v61 }
 0x65e   :  { %2188 = vst.msk [vmem:[%s4418_s13 + $0x28] sm:$0xff] %vm202_vm0, %v2156_v34  ;;  %v1921_v59 = vadd.f32 %v2891_v41, %v4198_v8  ;;  %v2894_v36 = vadd.f32 %v2893_v1, %v2892_v51 }
 0x660   :  { %v2029_v5 = vmax.f32 %v1921_v59, 0.0  ;;  %v1924_v6 = vadd.f32 %v2894_v36, %v4198_v8 }
 0x662   :  { %v2157_v9 = vmul.f32 %v2125_v48, %v2029_v5  ;;  %v2030_v44 = vmax.f32 %v1924_v6, 0.0  ;;  %v2895_v10 = vpop.f32.mrb[92].mxu1 }
 0x663   :  { %v2896_v13 = vpop.f32.mrb[93].mxu1 }
 0x664   :  { %2189 = vst.msk [vmem:[%s4418_s13 + $0x30] sm:$0xff] %vm202_vm0, %v2157_v9  ;;  %v2158_v14 = vmul.f32 %v2126_v7, %v2030_v44  ;;  %v2897_v15 = vadd.f32 %v2896_v13, %v2895_v10  ;;  %v2898_v16 = vpop.f32.mrb[94].mxu1  ;;  %v2133_v7 = vmul.f32 1.4285715, %v2494_v63  ;;  %v2565_v44 = vld [vmem:[%s4416_s10 + $0x40] sm:$0xff]  }
 0x665   :  { %v2899_v18 = vpop.f32.mrb[95].mxu1  ;;  %v2134_v13 = vmul.f32 1.4285715, %v2495_v45  ;;  %v2498_v17 = vunpack.c.l.bf16 %v2565_v44  ;;  %v2499_v22 = vunpack.c.h.bf16 %v2565_v44 }
 0x666   :  { %2190 = vst.msk [vmem:[%s4418_s13 + $0x38] sm:$0xff] %vm202_vm0, %v2158_v14  ;;  %v1929_v19 = vadd.f32 %v2897_v15, %v4198_v8  ;;  %v2900_v21 = vadd.f32 %v2899_v18, %v2898_v16 }
 0x668   :  { %v2031_v23 = vmax.f32 %v1929_v19, 0.0  ;;  %v1932_v24 = vadd.f32 %v2900_v21, %v4198_v8 }
 0x66a   :  { %v2159_v26 = vmul.f32 %v2127_v20, %v2031_v23  ;;  %v2032_v27 = vmax.f32 %v1932_v24, 0.0  ;;  %v2901_v28 = vpop.f32.mrb[96].mxu1 }
 0x66b   :  { %v2902_v30 = vpop.f32.mrb[97].mxu1 }
 0x66c   :  { %2191 = vst.msk [vmem:[%s4418_s13 + $0x40] sm:$0xff] %vm202_vm0, %v2159_v26  ;;  %v2160_v31 = vmul.f32 %v2128_v25, %v2032_v27  ;;  %v2903_v32 = vadd.f32 %v2902_v30, %v2901_v28  ;;  %v2904_v33 = vpop.f32.mrb[98].mxu1  ;;  %v2135_v25 = vmul.f32 1.4285715, %v2498_v17  ;;  %v2566_v27 = vld [vmem:[%s4416_s10 + $0x48] sm:$0xff]  }
 0x66d   :  { %v2905_v39 = vpop.f32.mrb[99].mxu1  ;;  %v2136_v30 = vmul.f32 1.4285715, %v2499_v22  ;;  %v2502_v62 = vunpack.c.l.bf16 %v2566_v27  ;;  %v2503_v46 = vunpack.c.h.bf16 %v2566_v27 }
 0x66e   :  { %2192 = vst.msk [vmem:[%s4418_s13 + $0x48] sm:$0xff] %vm202_vm0, %v2160_v31  ;;  %v1937_v38 = vadd.f32 %v2903_v32, %v4198_v8  ;;  %v2906_v0 = vadd.f32 %v2905_v39, %v2904_v33 }
 0x670   :  { %v2033_v50 = vmax.f32 %v1937_v38, 0.0  ;;  %v1940_v52 = vadd.f32 %v2906_v0, %v4198_v8 }
 0x672   :  { %v2161_v58 = vmul.f32 %v2129_v42, %v2033_v50  ;;  %v2034_v43 = vmax.f32 %v1940_v52, 0.0  ;;  %v2907_v35 = vpop.f32.mrb[100].mxu1 }
 0x673   :  { %v2908_v49 = vpop.f32.mrb[101].mxu1 }
 0x674   :  { %2193 = vst.msk [vmem:[%s4418_s13 + $0x50] sm:$0xff] %vm202_vm0, %v2161_v58  ;;  %v2162_v57 = vmul.f32 %v2130_v47, %v2034_v43  ;;  %v2909_v55 = vadd.f32 %v2908_v49, %v2907_v35  ;;  %v2910_v60 = vpop.f32.mrb[102].mxu1  ;;  %v2137_v47 = vmul.f32 1.4285715, %v2502_v62  ;;  %v2567_v43 = vld [vmem:[%s4416_s10 + $0x50] sm:$0xff]  }
 0x675   :  { %v2911_v4 = vpop.f32.mrb[103].mxu1  ;;  %v2138_v49 = vmul.f32 1.4285715, %v2503_v46  ;;  %v2506_v2 = vunpack.c.l.bf16 %v2567_v43  ;;  %v2507_v61 = vunpack.c.h.bf16 %v2567_v43 }
 0x676   :  { %2194 = vst.msk [vmem:[%s4418_s13 + $0x58] sm:$0xff] %vm202_vm0, %v2162_v57  ;;  %v1945_v54 = vadd.f32 %v2909_v55, %v4198_v8  ;;  %v2912_v12 = vadd.f32 %v2911_v4, %v2910_v60 }
 0x678   :  { %v2035_v53 = vmax.f32 %v1945_v54, 0.0  ;;  %v1948_v40 = vadd.f32 %v2912_v12, %v4198_v8 }
 0x67a   :  { %v2163_v34 = vmul.f32 %v2131_v37, %v2035_v53  ;;  %v2036_v41 = vmax.f32 %v1948_v40, 0.0  ;;  %v2913_v51 = vpop.f32.mrb[104].mxu1 }
 0x67b   :  { %v2914_v1 = vpop.f32.mrb[105].mxu1 }
 0x67c   :  { %2195 = vst.msk [vmem:[%s4418_s13 + $0x60] sm:$0xff] %vm202_vm0, %v2163_v34  ;;  %v2164_v59 = vmul.f32 %v2132_v3, %v2036_v41  ;;  %v2915_v48 = vadd.f32 %v2914_v1, %v2913_v51  ;;  %v2916_v36 = vpop.f32.mrb[106].mxu1  ;;  %v2139_v3 = vmul.f32 1.4285715, %v2506_v2  ;;  %v2568_v41 = vld [vmem:[%s4416_s10 + $0x58] sm:$0xff]  }
 0x67d   :  { %v2917_v5 = vpop.f32.mrb[107].mxu1  ;;  %v2140_v1 = vmul.f32 1.4285715, %v2507_v61  ;;  %v2510_v45 = vunpack.c.l.bf16 %v2568_v41  ;;  %v2511_v44 = vunpack.c.h.bf16 %v2568_v41 }
 0x67e   :  { %2196 = vst.msk [vmem:[%s4418_s13 + $0x68] sm:$0xff] %vm202_vm0, %v2164_v59  ;;  %v1953_v6 = vadd.f32 %v2915_v48, %v4198_v8  ;;  %v2918_v9 = vadd.f32 %v2917_v5, %v2916_v36 }
 0x680   :  { %v2037_v10 = vmax.f32 %v1953_v6, 0.0  ;;  %v1956_v11 = vadd.f32 %v2918_v9, %v4198_v8 }
 0x682   :  { %v2165_v14 = vmul.f32 %v2133_v7, %v2037_v10  ;;  %v2038_v15 = vmax.f32 %v1956_v11, 0.0  ;;  %v2919_v16 = vpop.f32.mrb[108].mxu1 }
 0x683   :  { %v2920_v18 = vpop.f32.mrb[109].mxu1 }
 0x684   :  { %2197 = vst.msk [vmem:[%s4418_s13 + $0x70] sm:$0xff] %vm202_vm0, %v2165_v14  ;;  %v2166_v19 = vmul.f32 %v2134_v13, %v2038_v15  ;;  %v2921_v20 = vadd.f32 %v2920_v18, %v2919_v16  ;;  %v2922_v21 = vpop.f32.mrb[110].mxu1  ;;  %v2141_v13 = vmul.f32 1.4285715, %v2510_v45  ;;  %v2569_v15 = vld [vmem:[%s4416_s10 + $0x60] sm:$0xff]  }
 0x685   :  { %v2923_v23 = vpop.f32.mrb[111].mxu1  ;;  %v2142_v18 = vmul.f32 1.4285715, %v2511_v44  ;;  %v2514_v22 = vunpack.c.l.bf16 %v2569_v15  ;;  %v2515_v27 = vunpack.c.h.bf16 %v2569_v15 }
 0x686   :  { %2198 = vst.msk [vmem:[%s4418_s13 + $0x78] sm:$0xff] %vm202_vm0, %v2166_v19  ;;  %v1961_v24 = vadd.f32 %v2921_v20, %v4198_v8  ;;  %v2924_v26 = vadd.f32 %v2923_v23, %v2922_v21 }
 0x688   :  { %v2039_v28 = vmax.f32 %v1961_v24, 0.0  ;;  %v1964_v29 = vadd.f32 %v2924_v26, %v4198_v8 }
 0x68a   :  { %v2167_v31 = vmul.f32 %v2135_v25, %v2039_v28  ;;  %v2040_v32 = vmax.f32 %v1964_v29, 0.0  ;;  %v2925_v33 = vpop.f32.mrb[112].mxu1 }
 0x68b   :  { %v2926_v39 = vpop.f32.mrb[113].mxu1 }
 0x68c   :  { %2199 = vst.msk [vmem:[%s4418_s13 + $0x80] sm:$0xff] %vm202_vm0, %v2167_v31  ;;  %v2168_v38 = vmul.f32 %v2136_v30, %v2040_v32  ;;  %v2927_v42 = vadd.f32 %v2926_v39, %v2925_v33  ;;  %v2928_v0 = vpop.f32.mrb[114].mxu1  ;;  %v2143_v30 = vmul.f32 1.4285715, %v2514_v22  ;;  %v2570_v32 = vld [vmem:[%s4416_s10 + $0x68] sm:$0xff]  }
 0x68d   :  { %v2929_v50 = vpop.f32.mrb[115].mxu1  ;;  %v2144_v39 = vmul.f32 1.4285715, %v2515_v27  ;;  %v2518_v46 = vunpack.c.l.bf16 %v2570_v32  ;;  %v2519_v43 = vunpack.c.h.bf16 %v2570_v32 }
 0x68e   :  { %2200 = vst.msk [vmem:[%s4418_s13 + $0x88] sm:$0xff] %vm202_vm0, %v2168_v38  ;;  %v1969_v52 = vadd.f32 %v2927_v42, %v4198_v8  ;;  %v2930_v58 = vadd.f32 %v2929_v50, %v2928_v0 }
 0x690   :  { %v2041_v35 = vmax.f32 %v1969_v52, 0.0  ;;  %v1972_v56 = vadd.f32 %v2930_v58, %v4198_v8 }
 0x692   :  { %v2169_v57 = vmul.f32 %v2137_v47, %v2041_v35  ;;  %v2042_v55 = vmax.f32 %v1972_v56, 0.0  ;;  %v2931_v60 = vpop.f32.mrb[116].mxu1 }
 0x693   :  { %v2932_v4 = vpop.f32.mrb[117].mxu1 }
 0x694   :  { %2201 = vst.msk [vmem:[%s4418_s13 + $0x90] sm:$0xff] %vm202_vm0, %v2169_v57  ;;  %v2170_v54 = vmul.f32 %v2138_v49, %v2042_v55  ;;  %v2933_v37 = vadd.f32 %v2932_v4, %v2931_v60  ;;  %v2934_v12 = vpop.f32.mrb[118].mxu1  ;;  %v2145_v49 = vmul.f32 1.4285715, %v2518_v46  ;;  %v2571_v55 = vld [vmem:[%s4416_s10 + $0x70] sm:$0xff]  }
 0x695   :  { %v2935_v53 = vpop.f32.mrb[119].mxu1  ;;  %v2146_v4 = vmul.f32 1.4285715, %v2519_v43  ;;  %v2522_v61 = vunpack.c.l.bf16 %v2571_v55  ;;  %v2523_v41 = vunpack.c.h.bf16 %v2571_v55 }
 0x696   :  { %2202 = vst.msk [vmem:[%s4418_s13 + $0x98] sm:$0xff] %vm202_vm0, %v2170_v54  ;;  %v1977_v40 = vadd.f32 %v2933_v37, %v4198_v8  ;;  %v2936_v34 = vadd.f32 %v2935_v53, %v2934_v12 }
 0x698   :  { %v2043_v51 = vmax.f32 %v1977_v40, 0.0  ;;  %v1980_v63 = vadd.f32 %v2936_v34, %v4198_v8 }
 0x69a   :  { %v2171_v59 = vmul.f32 %v2139_v3, %v2043_v51  ;;  %v2044_v48 = vmax.f32 %v1980_v63, 0.0  ;;  %v2937_v36 = vpop.f32.mrb[120].mxu1 }
 0x69b   :  { %v2938_v5 = vpop.f32.mrb[121].mxu1 }
 0x69c   :  { %2203 = vst.msk [vmem:[%s4418_s13 + $0xa0] sm:$0xff] %vm202_vm0, %v2171_v59  ;;  %v2172_v6 = vmul.f32 %v2140_v1, %v2044_v48  ;;  %v2939_v7 = vadd.f32 %v2938_v5, %v2937_v36  ;;  %v2940_v9 = vpop.f32.mrb[122].mxu1  ;;  %v2147_v1 = vmul.f32 1.4285715, %v2522_v61  ;;  %v2572_v48 = vld [vmem:[%s4416_s10 + $0x78] sm:$0xff]  }
 0x69d   :  { %v2941_v10 = vpop.f32.mrb[123].mxu1  ;;  %v2148_v5 = vmul.f32 1.4285715, %v2523_v41  ;;  %v2526_v44 = vunpack.c.l.bf16 %v2572_v48  ;;  %v2527_v15 = vunpack.c.h.bf16 %v2572_v48 }
 0x69e   :  { %2204 = vst.msk [vmem:[%s4418_s13 + $0xa8] sm:$0xff] %vm202_vm0, %v2172_v6  ;;  %v1985_v11 = vadd.f32 %v2939_v7, %v4198_v8  ;;  %v2942_v14 = vadd.f32 %v2941_v10, %v2940_v9 }
 0x69f   :  { %v2150_v22 = vmul.f32 1.4285715, %v2527_v15 }
 0x6a0   :  { %v2045_v16 = vmax.f32 %v1985_v11, 0.0  ;;  %v1988_v17 = vadd.f32 %v2942_v14, %v4198_v8 }
 0x6a2   :  { %v2173_v19 = vmul.f32 %v2141_v13, %v2045_v16  ;;  %v2046_v20 = vmax.f32 %v1988_v17, 0.0  ;;  %v2943_v21 = vpop.f32.mrb[124].mxu1 }
 0x6a3   :  { %v2944_v23 = vpop.f32.mrb[125].mxu1 }
 0x6a4   :  { %2205 = vst.msk [vmem:[%s4418_s13 + $0xb0] sm:$0xff] %vm202_vm0, %v2173_v19  ;;  %v2174_v24 = vmul.f32 %v2142_v18, %v2046_v20  ;;  %v2945_v25 = vadd.f32 %v2944_v23, %v2943_v21  ;;  %v2946_v26 = vpop.f32.mrb[126].mxu1  ;;  %v2149_v18 = vmul.f32 1.4285715, %v2526_v44 }
 0x6a5   :  { %v2947_v28 = vpop.f32.mrb[127].mxu1 }
 0x6a6   :  { %2206 = vst.msk [vmem:[%s4418_s13 + $0xb8] sm:$0xff] %vm202_vm0, %v2174_v24  ;;  %v1993_v29 = vadd.f32 %v2945_v25, %v4198_v8  ;;  %v2948_v31 = vadd.f32 %v2947_v28, %v2946_v26 }
 0x6a8   :  { %v2047_v33 = vmax.f32 %v1993_v29, 0.0  ;;  %v1996_v62 = vadd.f32 %v2948_v31, %v4198_v8 }
 0x6aa   :  { %v2175_v38 = vmul.f32 %v2143_v30, %v2047_v33  ;;  %v2048_v42 = vmax.f32 %v1996_v62, 0.0  ;;  %v2949_v0 = vpop.f32.mrb[128].mxu1 }
 0x6ab   :  { %v2950_v50 = vpop.f32.mrb[129].mxu1 }
 0x6ac   :  { %2207 = vst.msk [vmem:[%s4418_s13 + $0xc0] sm:$0xff] %vm202_vm0, %v2175_v38  ;;  %v2176_v52 = vmul.f32 %v2144_v39, %v2048_v42  ;;  %v2951_v47 = vadd.f32 %v2950_v50, %v2949_v0  ;;  %v2952_v58 = vpop.f32.mrb[130].mxu1 }
 0x6ad   :  { %v2953_v35 = vpop.f32.mrb[131].mxu1 }
 0x6ae   :  { %2208 = vst.msk [vmem:[%s4418_s13 + $0xc8] sm:$0xff] %vm202_vm0, %v2176_v52  ;;  %v2001_v56 = vadd.f32 %v2951_v47, %v4198_v8  ;;  %v2954_v57 = vadd.f32 %v2953_v35, %v2952_v58 }
 0x6b0   :  { %v2049_v60 = vmax.f32 %v2001_v56, 0.0  ;;  %v2004_v2 = vadd.f32 %v2954_v57, %v4198_v8 }
 0x6b2   :  { %v2177_v54 = vmul.f32 %v2145_v49, %v2049_v60  ;;  %v2050_v37 = vmax.f32 %v2004_v2, 0.0  ;;  %v2955_v12 = vpop.f32.mrb[132].mxu1 }
 0x6b3   :  { %v2956_v53 = vpop.f32.mrb[133].mxu1 }
 0x6b4   :  { %2209 = vst.msk [vmem:[%s4418_s13 + $0xd0] sm:$0xff] %vm202_vm0, %v2177_v54  ;;  %v2178_v40 = vmul.f32 %v2146_v4, %v2050_v37  ;;  %v2957_v3 = vadd.f32 %v2956_v53, %v2955_v12  ;;  %v2958_v34 = vpop.f32.mrb[134].mxu1 }
 0x6b5   :  { %v2959_v51 = vpop.f32.mrb[135].mxu1 }
 0x6b6   :  { %2210 = vst.msk [vmem:[%s4418_s13 + $0xd8] sm:$0xff] %vm202_vm0, %v2178_v40  ;;  %v2009_v63 = vadd.f32 %v2957_v3, %v4198_v8  ;;  %v2960_v59 = vadd.f32 %v2959_v51, %v2958_v34 }
 0x6b8   :  { %v2051_v36 = vmax.f32 %v2009_v63, 0.0  ;;  %v2012_v45 = vadd.f32 %v2960_v59, %v4198_v8 }
 0x6ba   :  { %v2179_v6 = vmul.f32 %v2147_v1, %v2051_v36  ;;  %v2052_v7 = vmax.f32 %v2012_v45, 0.0  ;;  %v2961_v9 = vpop.f32.mrb[136].mxu1 }
 0x6bb   :  { %v2962_v10 = vpop.f32.mrb[137].mxu1 }
 0x6bc   :  { %2211 = vst.msk [vmem:[%s4418_s13 + $0xe0] sm:$0xff] %vm202_vm0, %v2179_v6  ;;  %v2180_v11 = vmul.f32 %v2148_v5, %v2052_v7  ;;  %v2963_v13 = vadd.f32 %v2962_v10, %v2961_v9  ;;  %v2964_v14 = vpop.f32.mrb[138].mxu1 }
 0x6bd   :  { %v2965_v16 = vpop.f32.mrb[139].mxu1 }
 0x6be   :  { %2212 = vst.msk [vmem:[%s4418_s13 + $0xe8] sm:$0xff] %vm202_vm0, %v2180_v11  ;;  %v2017_v17 = vadd.f32 %v2963_v13, %v4198_v8  ;;  %v2966_v19 = vadd.f32 %v2965_v16, %v2964_v14 }
 0x6c0   :  { %v2053_v20 = vmax.f32 %v2017_v17, 0.0  ;;  %v2020_v21 = vadd.f32 %v2966_v19, %v4198_v8 }
 0x6c2   :  { %v2181_v23 = vmul.f32 %v2149_v18, %v2053_v20  ;;  %v2054_v24 = vmax.f32 %v2020_v21, 0.0 }
 0x6c4   :  { %2213 = vst.msk [vmem:[%s4418_s13 + $0xf0] sm:$0xff] %vm202_vm0, %v2181_v23  ;;  %v2182_v25 = vmul.f32 %v2150_v22, %v2054_v24 }
 0x6c6   :  { %2214 = vst.msk [vmem:[%s4418_s13 + $0xf8] sm:$0xff] %vm202_vm0, %v2182_v25 }

</bundles_post_ra>
